<compile_context>
chip_gen: v6e
topology: v6e:2x2x1
jax: 0.10.0
libtpu: 0.0.40
codegen_flags: <defaults>
</compile_context>

<pallas_src>
import functools

import jax
import jax.numpy as jnp
from jax.experimental import pallas as pl

LN_EPS = 1e-5  # torch.nn.LayerNorm default


def _decoder_layer_kernel(
    # activations
    tgt_ref,            # (B*T, D)
    mem_ref,            # (B*S, D)
    # self-attention: fused QKV weight/bias + output weight
    w_sqkv_ref,         # (D, 3D)
    b_sqkv_ref,         # (1, 3D)
    w_so_ref,           # (D, D)
    # cross-attention: fused QKV weight/bias + output weight
    w_cqkv_ref,         # (D, 3D)
    b_cqkv_ref,         # (1, 3D)
    w_co_ref,           # (D, D)
    # feed-forward
    w1_ref,             # (D, d_ff)
    b1_ref,             # (1, d_ff)
    w2_ref,             # (d_ff, D)
    # packed (1, D)-vectors: [b_self_o, b_cross_o, b2, g1, be1, g2, be2, g3, be3]
    vec_ref,            # (9, D)
    # output
    out_ref,            # (B*T, D)
    *, heads: int, B: int, T: int, S: int,
):
    D = tgt_ref.shape[-1]
    dk = D // heads
    scale = 1.0 / float(dk) ** 0.5

    x = tgt_ref[...].astype(jnp.float32)      # (B*T, D)
    mem = mem_ref[...].astype(jnp.float32)    # (B*S, D)

    vecs = vec_ref[...].astype(jnp.float32)   # (9, D)
    b_so, b_co, b2 = vecs[0:1], vecs[1:2], vecs[2:3]
    g1, be1 = vecs[3:4], vecs[4:5]
    g2, be2 = vecs[5:6], vecs[6:7]
    g3, be3 = vecs[7:8], vecs[8:9]

    def softmax_rows(s):
        s = s - jnp.max(s, axis=-1, keepdims=True)
        p = jnp.exp(s)
        # approx=True -> EUP vrcp (free slot); max-stabilized softmax makes the
        # approximate reciprocal numerically benign.
        return p * pl.reciprocal(jnp.sum(p, axis=-1, keepdims=True), approx=True)

    def attn_core(q, k, v, w_o, b_o, n_q, n_kv):
        # q: (B*n_q, D), k/v: (B*n_kv, D). Per batch & head, accumulate the
        # head context directly through the matching rows of Wo (no lane-axis
        # concat of head outputs).
        per_batch = []
        for b in range(B):                     # static unroll (B small)
            qb = q[b * n_q:(b + 1) * n_q, :]
            kb = k[b * n_kv:(b + 1) * n_kv, :]
            vb = v[b * n_kv:(b + 1) * n_kv, :]
            acc = None
            for h in range(heads):             # static unroll over heads
                qh = qb[:, h * dk:(h + 1) * dk]
                kh = kb[:, h * dk:(h + 1) * dk]
                vh = vb[:, h * dk:(h + 1) * dk]
                s = jnp.dot(qh, kh.T, preferred_element_type=jnp.float32) * scale
                p = softmax_rows(s)
                ctx_h = jnp.dot(p, vh, preferred_element_type=jnp.float32)
                contrib = jnp.dot(ctx_h, w_o[h * dk:(h + 1) * dk, :],
                                  preferred_element_type=jnp.float32)
                acc = contrib if acc is None else acc + contrib
            per_batch.append(acc)
        out = per_batch[0] if B == 1 else jnp.concatenate(per_batch, axis=0)
        return out + b_o

    def layer_norm(y, g, b):
        mu = jnp.mean(y, axis=-1, keepdims=True)
        var = jnp.mean((y - mu) ** 2, axis=-1, keepdims=True)
        return (y - mu) * jax.lax.rsqrt(var + LN_EPS) * g + b

    # 1) self-attention (fused QKV) + add & norm   (dropout1 == identity)
    qkv = jnp.dot(x, w_sqkv_ref[...], preferred_element_type=jnp.float32) \
        + b_sqkv_ref[...]
    q, k, v = qkv[:, :D], qkv[:, D:2 * D], qkv[:, 2 * D:]
    t2 = attn_core(q, k, v, w_so_ref[...], b_so, T, T)
    x = layer_norm(x + t2, g1, be1)

    # 2) cross-attention (fused K|V on memory) + add & norm (dropout2 == id.)
    w_cqkv = w_cqkv_ref[...]
    b_cqkv = b_cqkv_ref[...]
    qc = jnp.dot(x, w_cqkv[:, :D], preferred_element_type=jnp.float32) \
        + b_cqkv[:, :D]
    kvc = jnp.dot(mem, w_cqkv[:, D:], preferred_element_type=jnp.float32) \
        + b_cqkv[:, D:]
    kc, vc = kvc[:, :D], kvc[:, D:]
    t2 = attn_core(qc, kc, vc, w_co_ref[...], b_co, T, S)
    x = layer_norm(x + t2, g2, be2)

    # 3) position-wise FFN (relu) + add & norm  (dropout/dropout3 == identity)
    hmid = jnp.maximum(
        jnp.dot(x, w1_ref[...], preferred_element_type=jnp.float32) + b1_ref[...],
        0.0)
    t2 = jnp.dot(hmid, w2_ref[...], preferred_element_type=jnp.float32) + b2
    x = layer_norm(x + t2, g3, be3)

    out_ref[...] = x.astype(out_ref.dtype)

    # TODO(synk): tgt_mask / memory_mask / key_padding_mask paths not
    # implemented (the reference forward is exercised with all masks = None).


def transformer_decoder_layer(tgt, memory, params, heads):
    (sqw, sqb, skw, skb, svw, svb, sow, sob,
     cqw, cqb, ckw, ckb, cvw, cvb, cow, cob,
     w1, b1, w2, b2, g1, be1, g2, be2, g3, be3) = params
    B, T, D = tgt.shape
    _, S, _ = memory.shape

    # Wrapper-side packing (one-time XLA concats, outside the kernel):
    #   * fused QKV weight/bias per attention block
    #   * one (9, D) slab of all d_model-width vectors
    w_sqkv = jnp.concatenate([sqw, skw, svw], axis=1)       # (D, 3D)
    b_sqkv = jnp.concatenate([sqb, skb, svb], axis=1)       # (1, 3D)
    w_cqkv = jnp.concatenate([cqw, ckw, cvw], axis=1)       # (D, 3D)
    b_cqkv = jnp.concatenate([cqb, ckb, cvb], axis=1)       # (1, 3D)
    vec_slab = jnp.concatenate(
        [sob, cob, b2, g1, be1, g2, be2, g3, be3], axis=0)  # (9, D)

    kernel = functools.partial(_decoder_layer_kernel, heads=heads, B=B, T=T, S=S)

    # Single grid step: the whole batch + all parameters are resident in VMEM
    # (full-array blocks, default BlockSpecs).
    # TODO(synk): for v7x (2 TensorCores) with larger B, reintroduce a
    # "parallel" batch/row grid axis so both cores are used.
    out2d = pl.pallas_call(
        kernel,
        out_shape=jax.ShapeDtypeStruct((B * T, D), tgt.dtype),
    )(
        tgt.reshape(B * T, D), memory.reshape(B * S, D),
        w_sqkv, b_sqkv, sow,
        w_cqkv, b_cqkv, cow,
        w1, b1, w2,
        vec_slab,
    )
    return out2d.reshape(B, T, D)


def make_params(key, d_model, d_ff):
    """Deterministic synthetic parameters (weights stored as (in, out))."""
    ks = jax.random.split(key, 20)
    i = iter(range(20))

    def w(shape, scale=0.1):
        return (scale * jax.random.normal(ks[next(i)], shape)).astype(jnp.float32)

    def attn_params():
        return [
            w((d_model, d_model)), w((1, d_model)),  # Wq, bq
            w((d_model, d_model)), w((1, d_model)),  # Wk, bk
            w((d_model, d_model)), w((1, d_model)),  # Wv, bv
            w((d_model, d_model)), w((1, d_model)),  # Wo, bo
        ]

    params = []
    params += attn_params()                          # self-attention
    params += attn_params()                          # cross-attention
    params += [w((d_model, d_ff)), w((1, d_ff)),     # linear1
               w((d_ff, d_model)), w((1, d_model))]  # linear2
    for _ in range(3):                               # norm1..3: gamma, beta
        params += [jnp.ones((1, d_model), jnp.float32),
                   jnp.zeros((1, d_model), jnp.float32)]
    return params


def reference_forward(tgt, memory, params, heads):
    """Pure-JAX reference mirroring the PyTorch forward (eval mode)."""
    (sqw, sqb, skw, skb, svw, svb, sow, sob,
     cqw, cqb, ckw, ckb, cvw, cvb, cow, cob,
     w1, b1, w2, b2, g1, be1, g2, be2, g3, be3) = params
    D = tgt.shape[-1]
    dk = D // heads

    def mha(q_in, kv_in, wq, bq, wk, bk, wv, bv, wo, bo):
        B, T, _ = q_in.shape
        S = kv_in.shape[1]
        q = (q_in @ wq + bq).reshape(B, T, heads, dk)
        k = (kv_in @ wk + bk).reshape(B, S, heads, dk)
        v = (kv_in @ wv + bv).reshape(B, S, heads, dk)
        s = jnp.einsum("bthd,bshd->bhts", q, k) / jnp.sqrt(jnp.float32(dk))
        p = jax.nn.softmax(s, axis=-1)
        ctx = jnp.einsum("bhts,bshd->bthd", p, v).reshape(B, T, D)
        return ctx @ wo + bo

    def ln(x, g, b):
        mu = jnp.mean(x, -1, keepdims=True)
        var = jnp.mean((x - mu) ** 2, -1, keepdims=True)
        return (x - mu) * jax.lax.rsqrt(var + LN_EPS) * g + b

    x = ln(tgt + mha(tgt, tgt, sqw, sqb, skw, skb, svw, svb, sow, sob), g1, be1)
    x = ln(x + mha(x, memory, cqw, cqb, ckw, ckb, cvw, cvb, cow, cob), g2, be2)
    x = ln(x + (jnp.maximum(x @ w1 + b1, 0.0) @ w2 + b2), g3, be3)
    return x


if __name__ == "__main__":
    d_model, heads, d_ff = 32, 4, 64
    B, T, S = 2, 8, 8

    key = jax.random.PRNGKey(0)
    k_tgt, k_mem, k_par = jax.random.split(key, 3)
    tgt = jax.random.normal(k_tgt, (B, T, d_model), dtype=jnp.float32)
    memory = jax.random.normal(k_mem, (B, S, d_model), dtype=jnp.float32)
    params = make_params(k_par, d_model, d_ff)

    out = transformer_decoder_layer(tgt, memory, params, heads)
    out = jax.block_until_ready(out)

    ref = reference_forward(tgt, memory, params, heads)
    assert out.shape == (B, T, d_model)
    # Tolerance accounts for the EUP approximate-reciprocal softmax
    # (pl.reciprocal(..., approx=True)); still far tighter than any
    # structural/weights bug would produce.
    assert jnp.allclose(out, ref, atol=5e-3, rtol=5e-3), "mismatch vs reference"

    print("KERNEL_OK")
</pallas_src>

<mosaic_0001>
module attributes {stable_mosaic.version = 11 : i64} {
  func.func @_decoder_layer_kernel(%arg0: memref<16x32xf32, #tpu.memory_space<vmem>>, %arg1: memref<16x32xf32, #tpu.memory_space<vmem>>, %arg2: memref<32x96xf32, #tpu.memory_space<vmem>>, %arg3: memref<1x96xf32, #tpu.memory_space<vmem>>, %arg4: memref<32x32xf32, #tpu.memory_space<vmem>>, %arg5: memref<32x96xf32, #tpu.memory_space<vmem>>, %arg6: memref<1x96xf32, #tpu.memory_space<vmem>>, %arg7: memref<32x32xf32, #tpu.memory_space<vmem>>, %arg8: memref<32x64xf32, #tpu.memory_space<vmem>>, %arg9: memref<1x64xf32, #tpu.memory_space<vmem>>, %arg10: memref<64x32xf32, #tpu.memory_space<vmem>>, %arg11: memref<9x32xf32, #tpu.memory_space<vmem>>, %arg12: memref<16x32xf32, #tpu.memory_space<vmem>>) attributes {dimension_semantics = [], scalar_prefetch = 0 : i64, scratch_operands = 0 : i64, tpu.core_type = #tpu.core_type<tc>} {
    %c0 = arith.constant 0 : index
    %c0_0 = arith.constant 0 : index
    %0 = vector.load %arg0[%c0, %c0_0] : memref<16x32xf32, #tpu.memory_space<vmem>>, vector<16x32xf32>
    %c0_1 = arith.constant 0 : index
    %c0_2 = arith.constant 0 : index
    %1 = vector.load %arg1[%c0_1, %c0_2] : memref<16x32xf32, #tpu.memory_space<vmem>>, vector<16x32xf32>
    %c0_3 = arith.constant 0 : index
    %c0_4 = arith.constant 0 : index
    %2 = vector.load %arg11[%c0_3, %c0_4] : memref<9x32xf32, #tpu.memory_space<vmem>>, vector<9x32xf32>
    %3 = vector.extract_strided_slice %2 {offsets = [0, 0], sizes = [1, 32], strides = [1, 1]} : vector<9x32xf32> to vector<1x32xf32>
    %4 = vector.extract_strided_slice %2 {offsets = [1, 0], sizes = [1, 32], strides = [1, 1]} : vector<9x32xf32> to vector<1x32xf32>
    %5 = vector.extract_strided_slice %2 {offsets = [2, 0], sizes = [1, 32], strides = [1, 1]} : vector<9x32xf32> to vector<1x32xf32>
    %6 = vector.extract_strided_slice %2 {offsets = [3, 0], sizes = [1, 32], strides = [1, 1]} : vector<9x32xf32> to vector<1x32xf32>
    %7 = vector.extract_strided_slice %2 {offsets = [4, 0], sizes = [1, 32], strides = [1, 1]} : vector<9x32xf32> to vector<1x32xf32>
    %8 = vector.extract_strided_slice %2 {offsets = [5, 0], sizes = [1, 32], strides = [1, 1]} : vector<9x32xf32> to vector<1x32xf32>
    %9 = vector.extract_strided_slice %2 {offsets = [6, 0], sizes = [1, 32], strides = [1, 1]} : vector<9x32xf32> to vector<1x32xf32>
    %10 = vector.extract_strided_slice %2 {offsets = [7, 0], sizes = [1, 32], strides = [1, 1]} : vector<9x32xf32> to vector<1x32xf32>
    %11 = vector.extract_strided_slice %2 {offsets = [8, 0], sizes = [1, 32], strides = [1, 1]} : vector<9x32xf32> to vector<1x32xf32>
    %c0_5 = arith.constant 0 : index
    %c0_6 = arith.constant 0 : index
    %12 = vector.load %arg2[%c0_5, %c0_6] : memref<32x96xf32, #tpu.memory_space<vmem>>, vector<32x96xf32>
    %cst = arith.constant dense<0.000000e+00> : vector<16x96xf32>
    %13 = tpu.matmul %0, %12, %cst {dimension_numbers = #tpu.dot_dimension_numbers<[1], [0], [0], [1], [0, 0, 1, 1], [], []>} : vector<16x32xf32>, vector<32x96xf32>, vector<16x96xf32> -> vector<16x96xf32>
    %c0_7 = arith.constant 0 : index
    %c0_8 = arith.constant 0 : index
    %14 = vector.load %arg3[%c0_7, %c0_8] : memref<1x96xf32, #tpu.memory_space<vmem>>, vector<1x96xf32>
    %15 = vector.broadcast %14 : vector<1x96xf32> to vector<16x96xf32>
    %16 = arith.addf %13, %15 : vector<16x96xf32>
    %17 = vector.extract_strided_slice %16 {offsets = [0, 0], sizes = [16, 32], strides = [1, 1]} : vector<16x96xf32> to vector<16x32xf32>
    %18 = vector.extract_strided_slice %16 {offsets = [0, 32], sizes = [16, 32], strides = [1, 1]} : vector<16x96xf32> to vector<16x32xf32>
    %19 = vector.extract_strided_slice %16 {offsets = [0, 64], sizes = [16, 32], strides = [1, 1]} : vector<16x96xf32> to vector<16x32xf32>
    %c0_9 = arith.constant 0 : index
    %c0_10 = arith.constant 0 : index
    %20 = vector.load %arg4[%c0_9, %c0_10] : memref<32x32xf32, #tpu.memory_space<vmem>>, vector<32x32xf32>
    %21 = vector.extract_strided_slice %17 {offsets = [0, 0], sizes = [8, 32], strides = [1, 1]} : vector<16x32xf32> to vector<8x32xf32>
    %22 = vector.extract_strided_slice %18 {offsets = [0, 0], sizes = [8, 32], strides = [1, 1]} : vector<16x32xf32> to vector<8x32xf32>
    %23 = vector.extract_strided_slice %19 {offsets = [0, 0], sizes = [8, 32], strides = [1, 1]} : vector<16x32xf32> to vector<8x32xf32>
    %24 = vector.extract_strided_slice %21 {offsets = [0, 0], sizes = [8, 8], strides = [1, 1]} : vector<8x32xf32> to vector<8x8xf32>
    %25 = vector.extract_strided_slice %22 {offsets = [0, 0], sizes = [8, 8], strides = [1, 1]} : vector<8x32xf32> to vector<8x8xf32>
    %26 = vector.extract_strided_slice %23 {offsets = [0, 0], sizes = [8, 8], strides = [1, 1]} : vector<8x32xf32> to vector<8x8xf32>
    %27 = tpu.transpose %25, [1, 0] : vector<8x8xf32> -> vector<8x8xf32>
    %cst_11 = arith.constant dense<0.000000e+00> : vector<8x8xf32>
    %28 = tpu.matmul %24, %27, %cst_11 {dimension_numbers = #tpu.dot_dimension_numbers<[1], [0], [0], [1], [0, 0, 1, 1], [], []>} : vector<8x8xf32>, vector<8x8xf32>, vector<8x8xf32> -> vector<8x8xf32>
    %cst_12 = arith.constant 0.353553385 : f32
    %29 = vector.broadcast %cst_12 : f32 to vector<8x8xf32>
    %30 = arith.mulf %28, %29 : vector<8x8xf32>
    %cst_13 = arith.constant dense<0xFF800000> : vector<8xf32>
    %31 = vector.multi_reduction <maximumf>, %30, %cst_13 [1] : vector<8x8xf32> to vector<8xf32>
    %32 = vector.shape_cast %31 : vector<8xf32> to vector<8x1xf32>
    %33 = vector.broadcast %32 : vector<8x1xf32> to vector<8x8xf32>
    %34 = arith.subf %30, %33 : vector<8x8xf32>
    %35 = math.exp %34 : vector<8x8xf32>
    %cst_14 = arith.constant dense<0.000000e+00> : vector<8xf32>
    %36 = vector.multi_reduction <add>, %35, %cst_14 [1] : vector<8x8xf32> to vector<8xf32>
    %37 = vector.shape_cast %36 : vector<8xf32> to vector<8x1xf32>
    %38 = tpu.reciprocal %37 {approx = true} : vector<8x1xf32> -> vector<8x1xf32>
    %39 = vector.broadcast %38 : vector<8x1xf32> to vector<8x8xf32>
    %40 = arith.mulf %35, %39 : vector<8x8xf32>
    %cst_15 = arith.constant dense<0.000000e+00> : vector<8x8xf32>
    %41 = tpu.matmul %40, %26, %cst_15 {dimension_numbers = #tpu.dot_dimension_numbers<[1], [0], [0], [1], [0, 0, 1, 1], [], []>} : vector<8x8xf32>, vector<8x8xf32>, vector<8x8xf32> -> vector<8x8xf32>
    %42 = vector.extract_strided_slice %20 {offsets = [0, 0], sizes = [8, 32], strides = [1, 1]} : vector<32x32xf32> to vector<8x32xf32>
    %cst_16 = arith.constant dense<0.000000e+00> : vector<8x32xf32>
    %43 = tpu.matmul %41, %42, %cst_16 {dimension_numbers = #tpu.dot_dimension_numbers<[1], [0], [0], [1], [0, 0, 1, 1], [], []>} : vector<8x8xf32>, vector<8x32xf32>, vector<8x32xf32> -> vector<8x32xf32>
    %44 = vector.extract_strided_slice %21 {offsets = [0, 8], sizes = [8, 8], strides = [1, 1]} : vector<8x32xf32> to vector<8x8xf32>
    %45 = vector.extract_strided_slice %22 {offsets = [0, 8], sizes = [8, 8], strides = [1, 1]} : vector<8x32xf32> to vector<8x8xf32>
    %46 = vector.extract_strided_slice %23 {offsets = [0, 8], sizes = [8, 8], strides = [1, 1]} : vector<8x32xf32> to vector<8x8xf32>
    %47 = tpu.transpose %45, [1, 0] : vector<8x8xf32> -> vector<8x8xf32>
    %cst_17 = arith.constant dense<0.000000e+00> : vector<8x8xf32>
    %48 = tpu.matmul %44, %47, %cst_17 {dimension_numbers = #tpu.dot_dimension_numbers<[1], [0], [0], [1], [0, 0, 1, 1], [], []>} : vector<8x8xf32>, vector<8x8xf32>, vector<8x8xf32> -> vector<8x8xf32>
    %cst_18 = arith.constant 0.353553385 : f32
    %49 = vector.broadcast %cst_18 : f32 to vector<8x8xf32>
    %50 = arith.mulf %48, %49 : vector<8x8xf32>
    %cst_19 = arith.constant dense<0xFF800000> : vector<8xf32>
    %51 = vector.multi_reduction <maximumf>, %50, %cst_19 [1] : vector<8x8xf32> to vector<8xf32>
    %52 = vector.shape_cast %51 : vector<8xf32> to vector<8x1xf32>
    %53 = vector.broadcast %52 : vector<8x1xf32> to vector<8x8xf32>
    %54 = arith.subf %50, %53 : vector<8x8xf32>
    %55 = math.exp %54 : vector<8x8xf32>
    %cst_20 = arith.constant dense<0.000000e+00> : vector<8xf32>
    %56 = vector.multi_reduction <add>, %55, %cst_20 [1] : vector<8x8xf32> to vector<8xf32>
    %57 = vector.shape_cast %56 : vector<8xf32> to vector<8x1xf32>
    %58 = tpu.reciprocal %57 {approx = true} : vector<8x1xf32> -> vector<8x1xf32>
    %59 = vector.broadcast %58 : vector<8x1xf32> to vector<8x8xf32>
    %60 = arith.mulf %55, %59 : vector<8x8xf32>
    %cst_21 = arith.constant dense<0.000000e+00> : vector<8x8xf32>
    %61 = tpu.matmul %60, %46, %cst_21 {dimension_numbers = #tpu.dot_dimension_numbers<[1], [0], [0], [1], [0, 0, 1, 1], [], []>} : vector<8x8xf32>, vector<8x8xf32>, vector<8x8xf32> -> vector<8x8xf32>
    %62 = vector.extract_strided_slice %20 {offsets = [8, 0], sizes = [8, 32], strides = [1, 1]} : vector<32x32xf32> to vector<8x32xf32>
    %cst_22 = arith.constant dense<0.000000e+00> : vector<8x32xf32>
    %63 = tpu.matmul %61, %62, %cst_22 {dimension_numbers = #tpu.dot_dimension_numbers<[1], [0], [0], [1], [0, 0, 1, 1], [], []>} : vector<8x8xf32>, vector<8x32xf32>, vector<8x32xf32> -> vector<8x32xf32>
    %64 = arith.addf %43, %63 : vector<8x32xf32>
    %65 = vector.extract_strided_slice %21 {offsets = [0, 16], sizes = [8, 8], strides = [1, 1]} : vector<8x32xf32> to vector<8x8xf32>
    %66 = vector.extract_strided_slice %22 {offsets = [0, 16], sizes = [8, 8], strides = [1, 1]} : vector<8x32xf32> to vector<8x8xf32>
    %67 = vector.extract_strided_slice %23 {offsets = [0, 16], sizes = [8, 8], strides = [1, 1]} : vector<8x32xf32> to vector<8x8xf32>
    %68 = tpu.transpose %66, [1, 0] : vector<8x8xf32> -> vector<8x8xf32>
    %cst_23 = arith.constant dense<0.000000e+00> : vector<8x8xf32>
    %69 = tpu.matmul %65, %68, %cst_23 {dimension_numbers = #tpu.dot_dimension_numbers<[1], [0], [0], [1], [0, 0, 1, 1], [], []>} : vector<8x8xf32>, vector<8x8xf32>, vector<8x8xf32> -> vector<8x8xf32>
    %cst_24 = arith.constant 0.353553385 : f32
    %70 = vector.broadcast %cst_24 : f32 to vector<8x8xf32>
    %71 = arith.mulf %69, %70 : vector<8x8xf32>
    %cst_25 = arith.constant dense<0xFF800000> : vector<8xf32>
    %72 = vector.multi_reduction <maximumf>, %71, %cst_25 [1] : vector<8x8xf32> to vector<8xf32>
    %73 = vector.shape_cast %72 : vector<8xf32> to vector<8x1xf32>
    %74 = vector.broadcast %73 : vector<8x1xf32> to vector<8x8xf32>
    %75 = arith.subf %71, %74 : vector<8x8xf32>
    %76 = math.exp %75 : vector<8x8xf32>
    %cst_26 = arith.constant dense<0.000000e+00> : vector<8xf32>
    %77 = vector.multi_reduction <add>, %76, %cst_26 [1] : vector<8x8xf32> to vector<8xf32>
    %78 = vector.shape_cast %77 : vector<8xf32> to vector<8x1xf32>
    %79 = tpu.reciprocal %78 {approx = true} : vector<8x1xf32> -> vector<8x1xf32>
    %80 = vector.broadcast %79 : vector<8x1xf32> to vector<8x8xf32>
    %81 = arith.mulf %76, %80 : vector<8x8xf32>
    %cst_27 = arith.constant dense<0.000000e+00> : vector<8x8xf32>
    %82 = tpu.matmul %81, %67, %cst_27 {dimension_numbers = #tpu.dot_dimension_numbers<[1], [0], [0], [1], [0, 0, 1, 1], [], []>} : vector<8x8xf32>, vector<8x8xf32>, vector<8x8xf32> -> vector<8x8xf32>
    %83 = vector.extract_strided_slice %20 {offsets = [16, 0], sizes = [8, 32], strides = [1, 1]} : vector<32x32xf32> to vector<8x32xf32>
    %cst_28 = arith.constant dense<0.000000e+00> : vector<8x32xf32>
    %84 = tpu.matmul %82, %83, %cst_28 {dimension_numbers = #tpu.dot_dimension_numbers<[1], [0], [0], [1], [0, 0, 1, 1], [], []>} : vector<8x8xf32>, vector<8x32xf32>, vector<8x32xf32> -> vector<8x32xf32>
    %85 = arith.addf %64, %84 : vector<8x32xf32>
    %86 = vector.extract_strided_slice %21 {offsets = [0, 24], sizes = [8, 8], strides = [1, 1]} : vector<8x32xf32> to vector<8x8xf32>
    %87 = vector.extract_strided_slice %22 {offsets = [0, 24], sizes = [8, 8], strides = [1, 1]} : vector<8x32xf32> to vector<8x8xf32>
    %88 = vector.extract_strided_slice %23 {offsets = [0, 24], sizes = [8, 8], strides = [1, 1]} : vector<8x32xf32> to vector<8x8xf32>
    %89 = tpu.transpose %87, [1, 0] : vector<8x8xf32> -> vector<8x8xf32>
    %cst_29 = arith.constant dense<0.000000e+00> : vector<8x8xf32>
    %90 = tpu.matmul %86, %89, %cst_29 {dimension_numbers = #tpu.dot_dimension_numbers<[1], [0], [0], [1], [0, 0, 1, 1], [], []>} : vector<8x8xf32>, vector<8x8xf32>, vector<8x8xf32> -> vector<8x8xf32>
    %cst_30 = arith.constant 0.353553385 : f32
    %91 = vector.broadcast %cst_30 : f32 to vector<8x8xf32>
    %92 = arith.mulf %90, %91 : vector<8x8xf32>
    %cst_31 = arith.constant dense<0xFF800000> : vector<8xf32>
    %93 = vector.multi_reduction <maximumf>, %92, %cst_31 [1] : vector<8x8xf32> to vector<8xf32>
    %94 = vector.shape_cast %93 : vector<8xf32> to vector<8x1xf32>
    %95 = vector.broadcast %94 : vector<8x1xf32> to vector<8x8xf32>
    %96 = arith.subf %92, %95 : vector<8x8xf32>
    %97 = math.exp %96 : vector<8x8xf32>
    %cst_32 = arith.constant dense<0.000000e+00> : vector<8xf32>
    %98 = vector.multi_reduction <add>, %97, %cst_32 [1] : vector<8x8xf32> to vector<8xf32>
    %99 = vector.shape_cast %98 : vector<8xf32> to vector<8x1xf32>
    %100 = tpu.reciprocal %99 {approx = true} : vector<8x1xf32> -> vector<8x1xf32>
    %101 = vector.broadcast %100 : vector<8x1xf32> to vector<8x8xf32>
    %102 = arith.mulf %97, %101 : vector<8x8xf32>
    %cst_33 = arith.constant dense<0.000000e+00> : vector<8x8xf32>
    %103 = tpu.matmul %102, %88, %cst_33 {dimension_numbers = #tpu.dot_dimension_numbers<[1], [0], [0], [1], [0, 0, 1, 1], [], []>} : vector<8x8xf32>, vector<8x8xf32>, vector<8x8xf32> -> vector<8x8xf32>
    %104 = vector.extract_strided_slice %20 {offsets = [24, 0], sizes = [8, 32], strides = [1, 1]} : vector<32x32xf32> to vector<8x32xf32>
    %cst_34 = arith.constant dense<0.000000e+00> : vector<8x32xf32>
    %105 = tpu.matmul %103, %104, %cst_34 {dimension_numbers = #tpu.dot_dimension_numbers<[1], [0], [0], [1], [0, 0, 1, 1], [], []>} : vector<8x8xf32>, vector<8x32xf32>, vector<8x32xf32> -> vector<8x32xf32>
    %106 = arith.addf %85, %105 : vector<8x32xf32>
    %107 = vector.extract_strided_slice %17 {offsets = [8, 0], sizes = [8, 32], strides = [1, 1]} : vector<16x32xf32> to vector<8x32xf32>
    %108 = vector.extract_strided_slice %18 {offsets = [8, 0], sizes = [8, 32], strides = [1, 1]} : vector<16x32xf32> to vector<8x32xf32>
    %109 = vector.extract_strided_slice %19 {offsets = [8, 0], sizes = [8, 32], strides = [1, 1]} : vector<16x32xf32> to vector<8x32xf32>
    %110 = vector.extract_strided_slice %107 {offsets = [0, 0], sizes = [8, 8], strides = [1, 1]} : vector<8x32xf32> to vector<8x8xf32>
    %111 = vector.extract_strided_slice %108 {offsets = [0, 0], sizes = [8, 8], strides = [1, 1]} : vector<8x32xf32> to vector<8x8xf32>
    %112 = vector.extract_strided_slice %109 {offsets = [0, 0], sizes = [8, 8], strides = [1, 1]} : vector<8x32xf32> to vector<8x8xf32>
    %113 = tpu.transpose %111, [1, 0] : vector<8x8xf32> -> vector<8x8xf32>
    %cst_35 = arith.constant dense<0.000000e+00> : vector<8x8xf32>
    %114 = tpu.matmul %110, %113, %cst_35 {dimension_numbers = #tpu.dot_dimension_numbers<[1], [0], [0], [1], [0, 0, 1, 1], [], []>} : vector<8x8xf32>, vector<8x8xf32>, vector<8x8xf32> -> vector<8x8xf32>
    %cst_36 = arith.constant 0.353553385 : f32
    %115 = vector.broadcast %cst_36 : f32 to vector<8x8xf32>
    %116 = arith.mulf %114, %115 : vector<8x8xf32>
    %cst_37 = arith.constant dense<0xFF800000> : vector<8xf32>
    %117 = vector.multi_reduction <maximumf>, %116, %cst_37 [1] : vector<8x8xf32> to vector<8xf32>
    %118 = vector.shape_cast %117 : vector<8xf32> to vector<8x1xf32>
    %119 = vector.broadcast %118 : vector<8x1xf32> to vector<8x8xf32>
    %120 = arith.subf %116, %119 : vector<8x8xf32>
    %121 = math.exp %120 : vector<8x8xf32>
    %cst_38 = arith.constant dense<0.000000e+00> : vector<8xf32>
    %122 = vector.multi_reduction <add>, %121, %cst_38 [1] : vector<8x8xf32> to vector<8xf32>
    %123 = vector.shape_cast %122 : vector<8xf32> to vector<8x1xf32>
    %124 = tpu.reciprocal %123 {approx = true} : vector<8x1xf32> -> vector<8x1xf32>
    %125 = vector.broadcast %124 : vector<8x1xf32> to vector<8x8xf32>
    %126 = arith.mulf %121, %125 : vector<8x8xf32>
    %cst_39 = arith.constant dense<0.000000e+00> : vector<8x8xf32>
    %127 = tpu.matmul %126, %112, %cst_39 {dimension_numbers = #tpu.dot_dimension_numbers<[1], [0], [0], [1], [0, 0, 1, 1], [], []>} : vector<8x8xf32>, vector<8x8xf32>, vector<8x8xf32> -> vector<8x8xf32>
    %128 = vector.extract_strided_slice %20 {offsets = [0, 0], sizes = [8, 32], strides = [1, 1]} : vector<32x32xf32> to vector<8x32xf32>
    %cst_40 = arith.constant dense<0.000000e+00> : vector<8x32xf32>
    %129 = tpu.matmul %127, %128, %cst_40 {dimension_numbers = #tpu.dot_dimension_numbers<[1], [0], [0], [1], [0, 0, 1, 1], [], []>} : vector<8x8xf32>, vector<8x32xf32>, vector<8x32xf32> -> vector<8x32xf32>
    %130 = vector.extract_strided_slice %107 {offsets = [0, 8], sizes = [8, 8], strides = [1, 1]} : vector<8x32xf32> to vector<8x8xf32>
    %131 = vector.extract_strided_slice %108 {offsets = [0, 8], sizes = [8, 8], strides = [1, 1]} : vector<8x32xf32> to vector<8x8xf32>
    %132 = vector.extract_strided_slice %109 {offsets = [0, 8], sizes = [8, 8], strides = [1, 1]} : vector<8x32xf32> to vector<8x8xf32>
    %133 = tpu.transpose %131, [1, 0] : vector<8x8xf32> -> vector<8x8xf32>
    %cst_41 = arith.constant dense<0.000000e+00> : vector<8x8xf32>
    %134 = tpu.matmul %130, %133, %cst_41 {dimension_numbers = #tpu.dot_dimension_numbers<[1], [0], [0], [1], [0, 0, 1, 1], [], []>} : vector<8x8xf32>, vector<8x8xf32>, vector<8x8xf32> -> vector<8x8xf32>
    %cst_42 = arith.constant 0.353553385 : f32
    %135 = vector.broadcast %cst_42 : f32 to vector<8x8xf32>
    %136 = arith.mulf %134, %135 : vector<8x8xf32>
    %cst_43 = arith.constant dense<0xFF800000> : vector<8xf32>
    %137 = vector.multi_reduction <maximumf>, %136, %cst_43 [1] : vector<8x8xf32> to vector<8xf32>
    %138 = vector.shape_cast %137 : vector<8xf32> to vector<8x1xf32>
    %139 = vector.broadcast %138 : vector<8x1xf32> to vector<8x8xf32>
    %140 = arith.subf %136, %139 : vector<8x8xf32>
    %141 = math.exp %140 : vector<8x8xf32>
    %cst_44 = arith.constant dense<0.000000e+00> : vector<8xf32>
    %142 = vector.multi_reduction <add>, %141, %cst_44 [1] : vector<8x8xf32> to vector<8xf32>
    %143 = vector.shape_cast %142 : vector<8xf32> to vector<8x1xf32>
    %144 = tpu.reciprocal %143 {approx = true} : vector<8x1xf32> -> vector<8x1xf32>
    %145 = vector.broadcast %144 : vector<8x1xf32> to vector<8x8xf32>
    %146 = arith.mulf %141, %145 : vector<8x8xf32>
    %cst_45 = arith.constant dense<0.000000e+00> : vector<8x8xf32>
    %147 = tpu.matmul %146, %132, %cst_45 {dimension_numbers = #tpu.dot_dimension_numbers<[1], [0], [0], [1], [0, 0, 1, 1], [], []>} : vector<8x8xf32>, vector<8x8xf32>, vector<8x8xf32> -> vector<8x8xf32>
    %148 = vector.extract_strided_slice %20 {offsets = [8, 0], sizes = [8, 32], strides = [1, 1]} : vector<32x32xf32> to vector<8x32xf32>
    %cst_46 = arith.constant dense<0.000000e+00> : vector<8x32xf32>
    %149 = tpu.matmul %147, %148, %cst_46 {dimension_numbers = #tpu.dot_dimension_numbers<[1], [0], [0], [1], [0, 0, 1, 1], [], []>} : vector<8x8xf32>, vector<8x32xf32>, vector<8x32xf32> -> vector<8x32xf32>
    %150 = arith.addf %129, %149 : vector<8x32xf32>
    %151 = vector.extract_strided_slice %107 {offsets = [0, 16], sizes = [8, 8], strides = [1, 1]} : vector<8x32xf32> to vector<8x8xf32>
    %152 = vector.extract_strided_slice %108 {offsets = [0, 16], sizes = [8, 8], strides = [1, 1]} : vector<8x32xf32> to vector<8x8xf32>
    %153 = vector.extract_strided_slice %109 {offsets = [0, 16], sizes = [8, 8], strides = [1, 1]} : vector<8x32xf32> to vector<8x8xf32>
    %154 = tpu.transpose %152, [1, 0] : vector<8x8xf32> -> vector<8x8xf32>
    %cst_47 = arith.constant dense<0.000000e+00> : vector<8x8xf32>
    %155 = tpu.matmul %151, %154, %cst_47 {dimension_numbers = #tpu.dot_dimension_numbers<[1], [0], [0], [1], [0, 0, 1, 1], [], []>} : vector<8x8xf32>, vector<8x8xf32>, vector<8x8xf32> -> vector<8x8xf32>
    %cst_48 = arith.constant 0.353553385 : f32
    %156 = vector.broadcast %cst_48 : f32 to vector<8x8xf32>
    %157 = arith.mulf %155, %156 : vector<8x8xf32>
    %cst_49 = arith.constant dense<0xFF800000> : vector<8xf32>
    %158 = vector.multi_reduction <maximumf>, %157, %cst_49 [1] : vector<8x8xf32> to vector<8xf32>
    %159 = vector.shape_cast %158 : vector<8xf32> to vector<8x1xf32>
    %160 = vector.broadcast %159 : vector<8x1xf32> to vector<8x8xf32>
    %161 = arith.subf %157, %160 : vector<8x8xf32>
    %162 = math.exp %161 : vector<8x8xf32>
    %cst_50 = arith.constant dense<0.000000e+00> : vector<8xf32>
    %163 = vector.multi_reduction <add>, %162, %cst_50 [1] : vector<8x8xf32> to vector<8xf32>
    %164 = vector.shape_cast %163 : vector<8xf32> to vector<8x1xf32>
    %165 = tpu.reciprocal %164 {approx = true} : vector<8x1xf32> -> vector<8x1xf32>
    %166 = vector.broadcast %165 : vector<8x1xf32> to vector<8x8xf32>
    %167 = arith.mulf %162, %166 : vector<8x8xf32>
    %cst_51 = arith.constant dense<0.000000e+00> : vector<8x8xf32>
    %168 = tpu.matmul %167, %153, %cst_51 {dimension_numbers = #tpu.dot_dimension_numbers<[1], [0], [0], [1], [0, 0, 1, 1], [], []>} : vector<8x8xf32>, vector<8x8xf32>, vector<8x8xf32> -> vector<8x8xf32>
    %169 = vector.extract_strided_slice %20 {offsets = [16, 0], sizes = [8, 32], strides = [1, 1]} : vector<32x32xf32> to vector<8x32xf32>
    %cst_52 = arith.constant dense<0.000000e+00> : vector<8x32xf32>
    %170 = tpu.matmul %168, %169, %cst_52 {dimension_numbers = #tpu.dot_dimension_numbers<[1], [0], [0], [1], [0, 0, 1, 1], [], []>} : vector<8x8xf32>, vector<8x32xf32>, vector<8x32xf32> -> vector<8x32xf32>
    %171 = arith.addf %150, %170 : vector<8x32xf32>
    %172 = vector.extract_strided_slice %107 {offsets = [0, 24], sizes = [8, 8], strides = [1, 1]} : vector<8x32xf32> to vector<8x8xf32>
    %173 = vector.extract_strided_slice %108 {offsets = [0, 24], sizes = [8, 8], strides = [1, 1]} : vector<8x32xf32> to vector<8x8xf32>
    %174 = vector.extract_strided_slice %109 {offsets = [0, 24], sizes = [8, 8], strides = [1, 1]} : vector<8x32xf32> to vector<8x8xf32>
    %175 = tpu.transpose %173, [1, 0] : vector<8x8xf32> -> vector<8x8xf32>
    %cst_53 = arith.constant dense<0.000000e+00> : vector<8x8xf32>
    %176 = tpu.matmul %172, %175, %cst_53 {dimension_numbers = #tpu.dot_dimension_numbers<[1], [0], [0], [1], [0, 0, 1, 1], [], []>} : vector<8x8xf32>, vector<8x8xf32>, vector<8x8xf32> -> vector<8x8xf32>
    %cst_54 = arith.constant 0.353553385 : f32
    %177 = vector.broadcast %cst_54 : f32 to vector<8x8xf32>
    %178 = arith.mulf %176, %177 : vector<8x8xf32>
    %cst_55 = arith.constant dense<0xFF800000> : vector<8xf32>
    %179 = vector.multi_reduction <maximumf>, %178, %cst_55 [1] : vector<8x8xf32> to vector<8xf32>
    %180 = vector.shape_cast %179 : vector<8xf32> to vector<8x1xf32>
    %181 = vector.broadcast %180 : vector<8x1xf32> to vector<8x8xf32>
    %182 = arith.subf %178, %181 : vector<8x8xf32>
    %183 = math.exp %182 : vector<8x8xf32>
    %cst_56 = arith.constant dense<0.000000e+00> : vector<8xf32>
    %184 = vector.multi_reduction <add>, %183, %cst_56 [1] : vector<8x8xf32> to vector<8xf32>
    %185 = vector.shape_cast %184 : vector<8xf32> to vector<8x1xf32>
    %186 = tpu.reciprocal %185 {approx = true} : vector<8x1xf32> -> vector<8x1xf32>
    %187 = vector.broadcast %186 : vector<8x1xf32> to vector<8x8xf32>
    %188 = arith.mulf %183, %187 : vector<8x8xf32>
    %cst_57 = arith.constant dense<0.000000e+00> : vector<8x8xf32>
    %189 = tpu.matmul %188, %174, %cst_57 {dimension_numbers = #tpu.dot_dimension_numbers<[1], [0], [0], [1], [0, 0, 1, 1], [], []>} : vector<8x8xf32>, vector<8x8xf32>, vector<8x8xf32> -> vector<8x8xf32>
    %190 = vector.extract_strided_slice %20 {offsets = [24, 0], sizes = [8, 32], strides = [1, 1]} : vector<32x32xf32> to vector<8x32xf32>
    %cst_58 = arith.constant dense<0.000000e+00> : vector<8x32xf32>
    %191 = tpu.matmul %189, %190, %cst_58 {dimension_numbers = #tpu.dot_dimension_numbers<[1], [0], [0], [1], [0, 0, 1, 1], [], []>} : vector<8x8xf32>, vector<8x32xf32>, vector<8x32xf32> -> vector<8x32xf32>
    %192 = arith.addf %171, %191 : vector<8x32xf32>
    %193 = tpu.concatenate %106, %192 in 0 : vector<8x32xf32>, vector<8x32xf32> -> vector<16x32xf32>
    %194 = vector.broadcast %3 : vector<1x32xf32> to vector<16x32xf32>
    %195 = arith.addf %193, %194 : vector<16x32xf32>
    %196 = arith.addf %0, %195 : vector<16x32xf32>
    %cst_59 = arith.constant dense<0.000000e+00> : vector<16xf32>
    %197 = vector.multi_reduction <add>, %196, %cst_59 [1] : vector<16x32xf32> to vector<16xf32>
    %198 = vector.shape_cast %197 : vector<16xf32> to vector<16x1xf32>
    %cst_60 = arith.constant 3.200000e+01 : f32
    %199 = vector.broadcast %cst_60 : f32 to vector<16x1xf32>
    %200 = arith.divf %198, %199 : vector<16x1xf32>
    %201 = vector.broadcast %200 : vector<16x1xf32> to vector<16x32xf32>
    %202 = arith.subf %196, %201 : vector<16x32xf32>
    %203 = arith.mulf %202, %202 : vector<16x32xf32>
    %cst_61 = arith.constant dense<0.000000e+00> : vector<16xf32>
    %204 = vector.multi_reduction <add>, %203, %cst_61 [1] : vector<16x32xf32> to vector<16xf32>
    %205 = vector.shape_cast %204 : vector<16xf32> to vector<16x1xf32>
    %cst_62 = arith.constant 3.200000e+01 : f32
    %206 = vector.broadcast %cst_62 : f32 to vector<16x1xf32>
    %207 = arith.divf %205, %206 : vector<16x1xf32>
    %208 = vector.broadcast %200 : vector<16x1xf32> to vector<16x32xf32>
    %209 = arith.subf %196, %208 : vector<16x32xf32>
    %cst_63 = arith.constant 9.99999974E-6 : f32
    %210 = vector.broadcast %cst_63 : f32 to vector<16x1xf32>
    %211 = arith.addf %207, %210 : vector<16x1xf32>
    %212 = math.rsqrt %211 : vector<16x1xf32>
    %213 = vector.broadcast %212 : vector<16x1xf32> to vector<16x32xf32>
    %214 = arith.mulf %209, %213 : vector<16x32xf32>
    %215 = vector.broadcast %6 : vector<1x32xf32> to vector<16x32xf32>
    %216 = arith.mulf %214, %215 : vector<16x32xf32>
    %217 = vector.broadcast %7 : vector<1x32xf32> to vector<16x32xf32>
    %218 = arith.addf %216, %217 : vector<16x32xf32>
    %c0_64 = arith.constant 0 : index
    %c0_65 = arith.constant 0 : index
    %219 = vector.load %arg5[%c0_64, %c0_65] : memref<32x96xf32, #tpu.memory_space<vmem>>, vector<32x96xf32>
    %c0_66 = arith.constant 0 : index
    %c0_67 = arith.constant 0 : index
    %220 = vector.load %arg6[%c0_66, %c0_67] : memref<1x96xf32, #tpu.memory_space<vmem>>, vector<1x96xf32>
    %221 = vector.extract_strided_slice %219 {offsets = [0, 0], sizes = [32, 32], strides = [1, 1]} : vector<32x96xf32> to vector<32x32xf32>
    %cst_68 = arith.constant dense<0.000000e+00> : vector<16x32xf32>
    %222 = tpu.matmul %218, %221, %cst_68 {dimension_numbers = #tpu.dot_dimension_numbers<[1], [0], [0], [1], [0, 0, 1, 1], [], []>} : vector<16x32xf32>, vector<32x32xf32>, vector<16x32xf32> -> vector<16x32xf32>
    %223 = vector.extract_strided_slice %220 {offsets = [0, 0], sizes = [1, 32], strides = [1, 1]} : vector<1x96xf32> to vector<1x32xf32>
    %224 = vector.broadcast %223 : vector<1x32xf32> to vector<16x32xf32>
    %225 = arith.addf %222, %224 : vector<16x32xf32>
    %226 = vector.extract_strided_slice %219 {offsets = [0, 32], sizes = [32, 64], strides = [1, 1]} : vector<32x96xf32> to vector<32x64xf32>
    %cst_69 = arith.constant dense<0.000000e+00> : vector<16x64xf32>
    %227 = tpu.matmul %1, %226, %cst_69 {dimension_numbers = #tpu.dot_dimension_numbers<[1], [0], [0], [1], [0, 0, 1, 1], [], []>} : vector<16x32xf32>, vector<32x64xf32>, vector<16x64xf32> -> vector<16x64xf32>
    %228 = vector.extract_strided_slice %220 {offsets = [0, 32], sizes = [1, 64], strides = [1, 1]} : vector<1x96xf32> to vector<1x64xf32>
    %229 = vector.broadcast %228 : vector<1x64xf32> to vector<16x64xf32>
    %230 = arith.addf %227, %229 : vector<16x64xf32>
    %231 = vector.extract_strided_slice %230 {offsets = [0, 0], sizes = [16, 32], strides = [1, 1]} : vector<16x64xf32> to vector<16x32xf32>
    %232 = vector.extract_strided_slice %230 {offsets = [0, 32], sizes = [16, 32], strides = [1, 1]} : vector<16x64xf32> to vector<16x32xf32>
    %c0_70 = arith.constant 0 : index
    %c0_71 = arith.constant 0 : index
    %233 = vector.load %arg7[%c0_70, %c0_71] : memref<32x32xf32, #tpu.memory_space<vmem>>, vector<32x32xf32>
    %234 = vector.extract_strided_slice %225 {offsets = [0, 0], sizes = [8, 32], strides = [1, 1]} : vector<16x32xf32> to vector<8x32xf32>
    %235 = vector.extract_strided_slice %231 {offsets = [0, 0], sizes = [8, 32], strides = [1, 1]} : vector<16x32xf32> to vector<8x32xf32>
    %236 = vector.extract_strided_slice %232 {offsets = [0, 0], sizes = [8, 32], strides = [1, 1]} : vector<16x32xf32> to vector<8x32xf32>
    %237 = vector.extract_strided_slice %234 {offsets = [0, 0], sizes = [8, 8], strides = [1, 1]} : vector<8x32xf32> to vector<8x8xf32>
    %238 = vector.extract_strided_slice %235 {offsets = [0, 0], sizes = [8, 8], strides = [1, 1]} : vector<8x32xf32> to vector<8x8xf32>
    %239 = vector.extract_strided_slice %236 {offsets = [0, 0], sizes = [8, 8], strides = [1, 1]} : vector<8x32xf32> to vector<8x8xf32>
    %240 = tpu.transpose %238, [1, 0] : vector<8x8xf32> -> vector<8x8xf32>
    %cst_72 = arith.constant dense<0.000000e+00> : vector<8x8xf32>
    %241 = tpu.matmul %237, %240, %cst_72 {dimension_numbers = #tpu.dot_dimension_numbers<[1], [0], [0], [1], [0, 0, 1, 1], [], []>} : vector<8x8xf32>, vector<8x8xf32>, vector<8x8xf32> -> vector<8x8xf32>
    %cst_73 = arith.constant 0.353553385 : f32
    %242 = vector.broadcast %cst_73 : f32 to vector<8x8xf32>
    %243 = arith.mulf %241, %242 : vector<8x8xf32>
    %cst_74 = arith.constant dense<0xFF800000> : vector<8xf32>
    %244 = vector.multi_reduction <maximumf>, %243, %cst_74 [1] : vector<8x8xf32> to vector<8xf32>
    %245 = vector.shape_cast %244 : vector<8xf32> to vector<8x1xf32>
    %246 = vector.broadcast %245 : vector<8x1xf32> to vector<8x8xf32>
    %247 = arith.subf %243, %246 : vector<8x8xf32>
    %248 = math.exp %247 : vector<8x8xf32>
    %cst_75 = arith.constant dense<0.000000e+00> : vector<8xf32>
    %249 = vector.multi_reduction <add>, %248, %cst_75 [1] : vector<8x8xf32> to vector<8xf32>
    %250 = vector.shape_cast %249 : vector<8xf32> to vector<8x1xf32>
    %251 = tpu.reciprocal %250 {approx = true} : vector<8x1xf32> -> vector<8x1xf32>
    %252 = vector.broadcast %251 : vector<8x1xf32> to vector<8x8xf32>
    %253 = arith.mulf %248, %252 : vector<8x8xf32>
    %cst_76 = arith.constant dense<0.000000e+00> : vector<8x8xf32>
    %254 = tpu.matmul %253, %239, %cst_76 {dimension_numbers = #tpu.dot_dimension_numbers<[1], [0], [0], [1], [0, 0, 1, 1], [], []>} : vector<8x8xf32>, vector<8x8xf32>, vector<8x8xf32> -> vector<8x8xf32>
    %255 = vector.extract_strided_slice %233 {offsets = [0, 0], sizes = [8, 32], strides = [1, 1]} : vector<32x32xf32> to vector<8x32xf32>
    %cst_77 = arith.constant dense<0.000000e+00> : vector<8x32xf32>
    %256 = tpu.matmul %254, %255, %cst_77 {dimension_numbers = #tpu.dot_dimension_numbers<[1], [0], [0], [1], [0, 0, 1, 1], [], []>} : vector<8x8xf32>, vector<8x32xf32>, vector<8x32xf32> -> vector<8x32xf32>
    %257 = vector.extract_strided_slice %234 {offsets = [0, 8], sizes = [8, 8], strides = [1, 1]} : vector<8x32xf32> to vector<8x8xf32>
    %258 = vector.extract_strided_slice %235 {offsets = [0, 8], sizes = [8, 8], strides = [1, 1]} : vector<8x32xf32> to vector<8x8xf32>
    %259 = vector.extract_strided_slice %236 {offsets = [0, 8], sizes = [8, 8], strides = [1, 1]} : vector<8x32xf32> to vector<8x8xf32>
    %260 = tpu.transpose %258, [1, 0] : vector<8x8xf32> -> vector<8x8xf32>
    %cst_78 = arith.constant dense<0.000000e+00> : vector<8x8xf32>
    %261 = tpu.matmul %257, %260, %cst_78 {dimension_numbers = #tpu.dot_dimension_numbers<[1], [0], [0], [1], [0, 0, 1, 1], [], []>} : vector<8x8xf32>, vector<8x8xf32>, vector<8x8xf32> -> vector<8x8xf32>
    %cst_79 = arith.constant 0.353553385 : f32
    %262 = vector.broadcast %cst_79 : f32 to vector<8x8xf32>
    %263 = arith.mulf %261, %262 : vector<8x8xf32>
    %cst_80 = arith.constant dense<0xFF800000> : vector<8xf32>
    %264 = vector.multi_reduction <maximumf>, %263, %cst_80 [1] : vector<8x8xf32> to vector<8xf32>
    %265 = vector.shape_cast %264 : vector<8xf32> to vector<8x1xf32>
    %266 = vector.broadcast %265 : vector<8x1xf32> to vector<8x8xf32>
    %267 = arith.subf %263, %266 : vector<8x8xf32>
    %268 = math.exp %267 : vector<8x8xf32>
    %cst_81 = arith.constant dense<0.000000e+00> : vector<8xf32>
    %269 = vector.multi_reduction <add>, %268, %cst_81 [1] : vector<8x8xf32> to vector<8xf32>
    %270 = vector.shape_cast %269 : vector<8xf32> to vector<8x1xf32>
    %271 = tpu.reciprocal %270 {approx = true} : vector<8x1xf32> -> vector<8x1xf32>
    %272 = vector.broadcast %271 : vector<8x1xf32> to vector<8x8xf32>
    %273 = arith.mulf %268, %272 : vector<8x8xf32>
    %cst_82 = arith.constant dense<0.000000e+00> : vector<8x8xf32>
    %274 = tpu.matmul %273, %259, %cst_82 {dimension_numbers = #tpu.dot_dimension_numbers<[1], [0], [0], [1], [0, 0, 1, 1], [], []>} : vector<8x8xf32>, vector<8x8xf32>, vector<8x8xf32> -> vector<8x8xf32>
    %275 = vector.extract_strided_slice %233 {offsets = [8, 0], sizes = [8, 32], strides = [1, 1]} : vector<32x32xf32> to vector<8x32xf32>
    %cst_83 = arith.constant dense<0.000000e+00> : vector<8x32xf32>
    %276 = tpu.matmul %274, %275, %cst_83 {dimension_numbers = #tpu.dot_dimension_numbers<[1], [0], [0], [1], [0, 0, 1, 1], [], []>} : vector<8x8xf32>, vector<8x32xf32>, vector<8x32xf32> -> vector<8x32xf32>
    %277 = arith.addf %256, %276 : vector<8x32xf32>
    %278 = vector.extract_strided_slice %234 {offsets = [0, 16], sizes = [8, 8], strides = [1, 1]} : vector<8x32xf32> to vector<8x8xf32>
    %279 = vector.extract_strided_slice %235 {offsets = [0, 16], sizes = [8, 8], strides = [1, 1]} : vector<8x32xf32> to vector<8x8xf32>
    %280 = vector.extract_strided_slice %236 {offsets = [0, 16], sizes = [8, 8], strides = [1, 1]} : vector<8x32xf32> to vector<8x8xf32>
    %281 = tpu.transpose %279, [1, 0] : vector<8x8xf32> -> vector<8x8xf32>
    %cst_84 = arith.constant dense<0.000000e+00> : vector<8x8xf32>
    %282 = tpu.matmul %278, %281, %cst_84 {dimension_numbers = #tpu.dot_dimension_numbers<[1], [0], [0], [1], [0, 0, 1, 1], [], []>} : vector<8x8xf32>, vector<8x8xf32>, vector<8x8xf32> -> vector<8x8xf32>
    %cst_85 = arith.constant 0.353553385 : f32
    %283 = vector.broadcast %cst_85 : f32 to vector<8x8xf32>
    %284 = arith.mulf %282, %283 : vector<8x8xf32>
    %cst_86 = arith.constant dense<0xFF800000> : vector<8xf32>
    %285 = vector.multi_reduction <maximumf>, %284, %cst_86 [1] : vector<8x8xf32> to vector<8xf32>
    %286 = vector.shape_cast %285 : vector<8xf32> to vector<8x1xf32>
    %287 = vector.broadcast %286 : vector<8x1xf32> to vector<8x8xf32>
    %288 = arith.subf %284, %287 : vector<8x8xf32>
    %289 = math.exp %288 : vector<8x8xf32>
    %cst_87 = arith.constant dense<0.000000e+00> : vector<8xf32>
    %290 = vector.multi_reduction <add>, %289, %cst_87 [1] : vector<8x8xf32> to vector<8xf32>
    %291 = vector.shape_cast %290 : vector<8xf32> to vector<8x1xf32>
    %292 = tpu.reciprocal %291 {approx = true} : vector<8x1xf32> -> vector<8x1xf32>
    %293 = vector.broadcast %292 : vector<8x1xf32> to vector<8x8xf32>
    %294 = arith.mulf %289, %293 : vector<8x8xf32>
    %cst_88 = arith.constant dense<0.000000e+00> : vector<8x8xf32>
    %295 = tpu.matmul %294, %280, %cst_88 {dimension_numbers = #tpu.dot_dimension_numbers<[1], [0], [0], [1], [0, 0, 1, 1], [], []>} : vector<8x8xf32>, vector<8x8xf32>, vector<8x8xf32> -> vector<8x8xf32>
    %296 = vector.extract_strided_slice %233 {offsets = [16, 0], sizes = [8, 32], strides = [1, 1]} : vector<32x32xf32> to vector<8x32xf32>
    %cst_89 = arith.constant dense<0.000000e+00> : vector<8x32xf32>
    %297 = tpu.matmul %295, %296, %cst_89 {dimension_numbers = #tpu.dot_dimension_numbers<[1], [0], [0], [1], [0, 0, 1, 1], [], []>} : vector<8x8xf32>, vector<8x32xf32>, vector<8x32xf32> -> vector<8x32xf32>
    %298 = arith.addf %277, %297 : vector<8x32xf32>
    %299 = vector.extract_strided_slice %234 {offsets = [0, 24], sizes = [8, 8], strides = [1, 1]} : vector<8x32xf32> to vector<8x8xf32>
    %300 = vector.extract_strided_slice %235 {offsets = [0, 24], sizes = [8, 8], strides = [1, 1]} : vector<8x32xf32> to vector<8x8xf32>
    %301 = vector.extract_strided_slice %236 {offsets = [0, 24], sizes = [8, 8], strides = [1, 1]} : vector<8x32xf32> to vector<8x8xf32>
    %302 = tpu.transpose %300, [1, 0] : vector<8x8xf32> -> vector<8x8xf32>
    %cst_90 = arith.constant dense<0.000000e+00> : vector<8x8xf32>
    %303 = tpu.matmul %299, %302, %cst_90 {dimension_numbers = #tpu.dot_dimension_numbers<[1], [0], [0], [1], [0, 0, 1, 1], [], []>} : vector<8x8xf32>, vector<8x8xf32>, vector<8x8xf32> -> vector<8x8xf32>
    %cst_91 = arith.constant 0.353553385 : f32
    %304 = vector.broadcast %cst_91 : f32 to vector<8x8xf32>
    %305 = arith.mulf %303, %304 : vector<8x8xf32>
    %cst_92 = arith.constant dense<0xFF800000> : vector<8xf32>
    %306 = vector.multi_reduction <maximumf>, %305, %cst_92 [1] : vector<8x8xf32> to vector<8xf32>
    %307 = vector.shape_cast %306 : vector<8xf32> to vector<8x1xf32>
    %308 = vector.broadcast %307 : vector<8x1xf32> to vector<8x8xf32>
    %309 = arith.subf %305, %308 : vector<8x8xf32>
    %310 = math.exp %309 : vector<8x8xf32>
    %cst_93 = arith.constant dense<0.000000e+00> : vector<8xf32>
    %311 = vector.multi_reduction <add>, %310, %cst_93 [1] : vector<8x8xf32> to vector<8xf32>
    %312 = vector.shape_cast %311 : vector<8xf32> to vector<8x1xf32>
    %313 = tpu.reciprocal %312 {approx = true} : vector<8x1xf32> -> vector<8x1xf32>
    %314 = vector.broadcast %313 : vector<8x1xf32> to vector<8x8xf32>
    %315 = arith.mulf %310, %314 : vector<8x8xf32>
    %cst_94 = arith.constant dense<0.000000e+00> : vector<8x8xf32>
    %316 = tpu.matmul %315, %301, %cst_94 {dimension_numbers = #tpu.dot_dimension_numbers<[1], [0], [0], [1], [0, 0, 1, 1], [], []>} : vector<8x8xf32>, vector<8x8xf32>, vector<8x8xf32> -> vector<8x8xf32>
    %317 = vector.extract_strided_slice %233 {offsets = [24, 0], sizes = [8, 32], strides = [1, 1]} : vector<32x32xf32> to vector<8x32xf32>
    %cst_95 = arith.constant dense<0.000000e+00> : vector<8x32xf32>
    %318 = tpu.matmul %316, %317, %cst_95 {dimension_numbers = #tpu.dot_dimension_numbers<[1], [0], [0], [1], [0, 0, 1, 1], [], []>} : vector<8x8xf32>, vector<8x32xf32>, vector<8x32xf32> -> vector<8x32xf32>
    %319 = arith.addf %298, %318 : vector<8x32xf32>
    %320 = vector.extract_strided_slice %225 {offsets = [8, 0], sizes = [8, 32], strides = [1, 1]} : vector<16x32xf32> to vector<8x32xf32>
    %321 = vector.extract_strided_slice %231 {offsets = [8, 0], sizes = [8, 32], strides = [1, 1]} : vector<16x32xf32> to vector<8x32xf32>
    %322 = vector.extract_strided_slice %232 {offsets = [8, 0], sizes = [8, 32], strides = [1, 1]} : vector<16x32xf32> to vector<8x32xf32>
    %323 = vector.extract_strided_slice %320 {offsets = [0, 0], sizes = [8, 8], strides = [1, 1]} : vector<8x32xf32> to vector<8x8xf32>
    %324 = vector.extract_strided_slice %321 {offsets = [0, 0], sizes = [8, 8], strides = [1, 1]} : vector<8x32xf32> to vector<8x8xf32>
    %325 = vector.extract_strided_slice %322 {offsets = [0, 0], sizes = [8, 8], strides = [1, 1]} : vector<8x32xf32> to vector<8x8xf32>
    %326 = tpu.transpose %324, [1, 0] : vector<8x8xf32> -> vector<8x8xf32>
    %cst_96 = arith.constant dense<0.000000e+00> : vector<8x8xf32>
    %327 = tpu.matmul %323, %326, %cst_96 {dimension_numbers = #tpu.dot_dimension_numbers<[1], [0], [0], [1], [0, 0, 1, 1], [], []>} : vector<8x8xf32>, vector<8x8xf32>, vector<8x8xf32> -> vector<8x8xf32>
    %cst_97 = arith.constant 0.353553385 : f32
    %328 = vector.broadcast %cst_97 : f32 to vector<8x8xf32>
    %329 = arith.mulf %327, %328 : vector<8x8xf32>
    %cst_98 = arith.constant dense<0xFF800000> : vector<8xf32>
    %330 = vector.multi_reduction <maximumf>, %329, %cst_98 [1] : vector<8x8xf32> to vector<8xf32>
    %331 = vector.shape_cast %330 : vector<8xf32> to vector<8x1xf32>
    %332 = vector.broadcast %331 : vector<8x1xf32> to vector<8x8xf32>
    %333 = arith.subf %329, %332 : vector<8x8xf32>
    %334 = math.exp %333 : vector<8x8xf32>
    %cst_99 = arith.constant dense<0.000000e+00> : vector<8xf32>
    %335 = vector.multi_reduction <add>, %334, %cst_99 [1] : vector<8x8xf32> to vector<8xf32>
    %336 = vector.shape_cast %335 : vector<8xf32> to vector<8x1xf32>
    %337 = tpu.reciprocal %336 {approx = true} : vector<8x1xf32> -> vector<8x1xf32>
    %338 = vector.broadcast %337 : vector<8x1xf32> to vector<8x8xf32>
    %339 = arith.mulf %334, %338 : vector<8x8xf32>
    %cst_100 = arith.constant dense<0.000000e+00> : vector<8x8xf32>
    %340 = tpu.matmul %339, %325, %cst_100 {dimension_numbers = #tpu.dot_dimension_numbers<[1], [0], [0], [1], [0, 0, 1, 1], [], []>} : vector<8x8xf32>, vector<8x8xf32>, vector<8x8xf32> -> vector<8x8xf32>
    %341 = vector.extract_strided_slice %233 {offsets = [0, 0], sizes = [8, 32], strides = [1, 1]} : vector<32x32xf32> to vector<8x32xf32>
    %cst_101 = arith.constant dense<0.000000e+00> : vector<8x32xf32>
    %342 = tpu.matmul %340, %341, %cst_101 {dimension_numbers = #tpu.dot_dimension_numbers<[1], [0], [0], [1], [0, 0, 1, 1], [], []>} : vector<8x8xf32>, vector<8x32xf32>, vector<8x32xf32> -> vector<8x32xf32>
    %343 = vector.extract_strided_slice %320 {offsets = [0, 8], sizes = [8, 8], strides = [1, 1]} : vector<8x32xf32> to vector<8x8xf32>
    %344 = vector.extract_strided_slice %321 {offsets = [0, 8], sizes = [8, 8], strides = [1, 1]} : vector<8x32xf32> to vector<8x8xf32>
    %345 = vector.extract_strided_slice %322 {offsets = [0, 8], sizes = [8, 8], strides = [1, 1]} : vector<8x32xf32> to vector<8x8xf32>
    %346 = tpu.transpose %344, [1, 0] : vector<8x8xf32> -> vector<8x8xf32>
    %cst_102 = arith.constant dense<0.000000e+00> : vector<8x8xf32>
    %347 = tpu.matmul %343, %346, %cst_102 {dimension_numbers = #tpu.dot_dimension_numbers<[1], [0], [0], [1], [0, 0, 1, 1], [], []>} : vector<8x8xf32>, vector<8x8xf32>, vector<8x8xf32> -> vector<8x8xf32>
    %cst_103 = arith.constant 0.353553385 : f32
    %348 = vector.broadcast %cst_103 : f32 to vector<8x8xf32>
    %349 = arith.mulf %347, %348 : vector<8x8xf32>
    %cst_104 = arith.constant dense<0xFF800000> : vector<8xf32>
    %350 = vector.multi_reduction <maximumf>, %349, %cst_104 [1] : vector<8x8xf32> to vector<8xf32>
    %351 = vector.shape_cast %350 : vector<8xf32> to vector<8x1xf32>
    %352 = vector.broadcast %351 : vector<8x1xf32> to vector<8x8xf32>
    %353 = arith.subf %349, %352 : vector<8x8xf32>
    %354 = math.exp %353 : vector<8x8xf32>
    %cst_105 = arith.constant dense<0.000000e+00> : vector<8xf32>
    %355 = vector.multi_reduction <add>, %354, %cst_105 [1] : vector<8x8xf32> to vector<8xf32>
    %356 = vector.shape_cast %355 : vector<8xf32> to vector<8x1xf32>
    %357 = tpu.reciprocal %356 {approx = true} : vector<8x1xf32> -> vector<8x1xf32>
    %358 = vector.broadcast %357 : vector<8x1xf32> to vector<8x8xf32>
    %359 = arith.mulf %354, %358 : vector<8x8xf32>
    %cst_106 = arith.constant dense<0.000000e+00> : vector<8x8xf32>
    %360 = tpu.matmul %359, %345, %cst_106 {dimension_numbers = #tpu.dot_dimension_numbers<[1], [0], [0], [1], [0, 0, 1, 1], [], []>} : vector<8x8xf32>, vector<8x8xf32>, vector<8x8xf32> -> vector<8x8xf32>
    %361 = vector.extract_strided_slice %233 {offsets = [8, 0], sizes = [8, 32], strides = [1, 1]} : vector<32x32xf32> to vector<8x32xf32>
    %cst_107 = arith.constant dense<0.000000e+00> : vector<8x32xf32>
    %362 = tpu.matmul %360, %361, %cst_107 {dimension_numbers = #tpu.dot_dimension_numbers<[1], [0], [0], [1], [0, 0, 1, 1], [], []>} : vector<8x8xf32>, vector<8x32xf32>, vector<8x32xf32> -> vector<8x32xf32>
    %363 = arith.addf %342, %362 : vector<8x32xf32>
    %364 = vector.extract_strided_slice %320 {offsets = [0, 16], sizes = [8, 8], strides = [1, 1]} : vector<8x32xf32> to vector<8x8xf32>
    %365 = vector.extract_strided_slice %321 {offsets = [0, 16], sizes = [8, 8], strides = [1, 1]} : vector<8x32xf32> to vector<8x8xf32>
    %366 = vector.extract_strided_slice %322 {offsets = [0, 16], sizes = [8, 8], strides = [1, 1]} : vector<8x32xf32> to vector<8x8xf32>
    %367 = tpu.transpose %365, [1, 0] : vector<8x8xf32> -> vector<8x8xf32>
    %cst_108 = arith.constant dense<0.000000e+00> : vector<8x8xf32>
    %368 = tpu.matmul %364, %367, %cst_108 {dimension_numbers = #tpu.dot_dimension_numbers<[1], [0], [0], [1], [0, 0, 1, 1], [], []>} : vector<8x8xf32>, vector<8x8xf32>, vector<8x8xf32> -> vector<8x8xf32>
    %cst_109 = arith.constant 0.353553385 : f32
    %369 = vector.broadcast %cst_109 : f32 to vector<8x8xf32>
    %370 = arith.mulf %368, %369 : vector<8x8xf32>
    %cst_110 = arith.constant dense<0xFF800000> : vector<8xf32>
    %371 = vector.multi_reduction <maximumf>, %370, %cst_110 [1] : vector<8x8xf32> to vector<8xf32>
    %372 = vector.shape_cast %371 : vector<8xf32> to vector<8x1xf32>
    %373 = vector.broadcast %372 : vector<8x1xf32> to vector<8x8xf32>
    %374 = arith.subf %370, %373 : vector<8x8xf32>
    %375 = math.exp %374 : vector<8x8xf32>
    %cst_111 = arith.constant dense<0.000000e+00> : vector<8xf32>
    %376 = vector.multi_reduction <add>, %375, %cst_111 [1] : vector<8x8xf32> to vector<8xf32>
    %377 = vector.shape_cast %376 : vector<8xf32> to vector<8x1xf32>
    %378 = tpu.reciprocal %377 {approx = true} : vector<8x1xf32> -> vector<8x1xf32>
    %379 = vector.broadcast %378 : vector<8x1xf32> to vector<8x8xf32>
    %380 = arith.mulf %375, %379 : vector<8x8xf32>
    %cst_112 = arith.constant dense<0.000000e+00> : vector<8x8xf32>
    %381 = tpu.matmul %380, %366, %cst_112 {dimension_numbers = #tpu.dot_dimension_numbers<[1], [0], [0], [1], [0, 0, 1, 1], [], []>} : vector<8x8xf32>, vector<8x8xf32>, vector<8x8xf32> -> vector<8x8xf32>
    %382 = vector.extract_strided_slice %233 {offsets = [16, 0], sizes = [8, 32], strides = [1, 1]} : vector<32x32xf32> to vector<8x32xf32>
    %cst_113 = arith.constant dense<0.000000e+00> : vector<8x32xf32>
    %383 = tpu.matmul %381, %382, %cst_113 {dimension_numbers = #tpu.dot_dimension_numbers<[1], [0], [0], [1], [0, 0, 1, 1], [], []>} : vector<8x8xf32>, vector<8x32xf32>, vector<8x32xf32> -> vector<8x32xf32>
    %384 = arith.addf %363, %383 : vector<8x32xf32>
    %385 = vector.extract_strided_slice %320 {offsets = [0, 24], sizes = [8, 8], strides = [1, 1]} : vector<8x32xf32> to vector<8x8xf32>
    %386 = vector.extract_strided_slice %321 {offsets = [0, 24], sizes = [8, 8], strides = [1, 1]} : vector<8x32xf32> to vector<8x8xf32>
    %387 = vector.extract_strided_slice %322 {offsets = [0, 24], sizes = [8, 8], strides = [1, 1]} : vector<8x32xf32> to vector<8x8xf32>
    %388 = tpu.transpose %386, [1, 0] : vector<8x8xf32> -> vector<8x8xf32>
    %cst_114 = arith.constant dense<0.000000e+00> : vector<8x8xf32>
    %389 = tpu.matmul %385, %388, %cst_114 {dimension_numbers = #tpu.dot_dimension_numbers<[1], [0], [0], [1], [0, 0, 1, 1], [], []>} : vector<8x8xf32>, vector<8x8xf32>, vector<8x8xf32> -> vector<8x8xf32>
    %cst_115 = arith.constant 0.353553385 : f32
    %390 = vector.broadcast %cst_115 : f32 to vector<8x8xf32>
    %391 = arith.mulf %389, %390 : vector<8x8xf32>
    %cst_116 = arith.constant dense<0xFF800000> : vector<8xf32>
    %392 = vector.multi_reduction <maximumf>, %391, %cst_116 [1] : vector<8x8xf32> to vector<8xf32>
    %393 = vector.shape_cast %392 : vector<8xf32> to vector<8x1xf32>
    %394 = vector.broadcast %393 : vector<8x1xf32> to vector<8x8xf32>
    %395 = arith.subf %391, %394 : vector<8x8xf32>
    %396 = math.exp %395 : vector<8x8xf32>
    %cst_117 = arith.constant dense<0.000000e+00> : vector<8xf32>
    %397 = vector.multi_reduction <add>, %396, %cst_117 [1] : vector<8x8xf32> to vector<8xf32>
    %398 = vector.shape_cast %397 : vector<8xf32> to vector<8x1xf32>
    %399 = tpu.reciprocal %398 {approx = true} : vector<8x1xf32> -> vector<8x1xf32>
    %400 = vector.broadcast %399 : vector<8x1xf32> to vector<8x8xf32>
    %401 = arith.mulf %396, %400 : vector<8x8xf32>
    %cst_118 = arith.constant dense<0.000000e+00> : vector<8x8xf32>
    %402 = tpu.matmul %401, %387, %cst_118 {dimension_numbers = #tpu.dot_dimension_numbers<[1], [0], [0], [1], [0, 0, 1, 1], [], []>} : vector<8x8xf32>, vector<8x8xf32>, vector<8x8xf32> -> vector<8x8xf32>
    %403 = vector.extract_strided_slice %233 {offsets = [24, 0], sizes = [8, 32], strides = [1, 1]} : vector<32x32xf32> to vector<8x32xf32>
    %cst_119 = arith.constant dense<0.000000e+00> : vector<8x32xf32>
    %404 = tpu.matmul %402, %403, %cst_119 {dimension_numbers = #tpu.dot_dimension_numbers<[1], [0], [0], [1], [0, 0, 1, 1], [], []>} : vector<8x8xf32>, vector<8x32xf32>, vector<8x32xf32> -> vector<8x32xf32>
    %405 = arith.addf %384, %404 : vector<8x32xf32>
    %406 = tpu.concatenate %319, %405 in 0 : vector<8x32xf32>, vector<8x32xf32> -> vector<16x32xf32>
    %407 = vector.broadcast %4 : vector<1x32xf32> to vector<16x32xf32>
    %408 = arith.addf %406, %407 : vector<16x32xf32>
    %409 = arith.addf %218, %408 : vector<16x32xf32>
    %cst_120 = arith.constant dense<0.000000e+00> : vector<16xf32>
    %410 = vector.multi_reduction <add>, %409, %cst_120 [1] : vector<16x32xf32> to vector<16xf32>
    %411 = vector.shape_cast %410 : vector<16xf32> to vector<16x1xf32>
    %cst_121 = arith.constant 3.200000e+01 : f32
    %412 = vector.broadcast %cst_121 : f32 to vector<16x1xf32>
    %413 = arith.divf %411, %412 : vector<16x1xf32>
    %414 = vector.broadcast %413 : vector<16x1xf32> to vector<16x32xf32>
    %415 = arith.subf %409, %414 : vector<16x32xf32>
    %416 = arith.mulf %415, %415 : vector<16x32xf32>
    %cst_122 = arith.constant dense<0.000000e+00> : vector<16xf32>
    %417 = vector.multi_reduction <add>, %416, %cst_122 [1] : vector<16x32xf32> to vector<16xf32>
    %418 = vector.shape_cast %417 : vector<16xf32> to vector<16x1xf32>
    %cst_123 = arith.constant 3.200000e+01 : f32
    %419 = vector.broadcast %cst_123 : f32 to vector<16x1xf32>
    %420 = arith.divf %418, %419 : vector<16x1xf32>
    %421 = vector.broadcast %413 : vector<16x1xf32> to vector<16x32xf32>
    %422 = arith.subf %409, %421 : vector<16x32xf32>
    %cst_124 = arith.constant 9.99999974E-6 : f32
    %423 = vector.broadcast %cst_124 : f32 to vector<16x1xf32>
    %424 = arith.addf %420, %423 : vector<16x1xf32>
    %425 = math.rsqrt %424 : vector<16x1xf32>
    %426 = vector.broadcast %425 : vector<16x1xf32> to vector<16x32xf32>
    %427 = arith.mulf %422, %426 : vector<16x32xf32>
    %428 = vector.broadcast %8 : vector<1x32xf32> to vector<16x32xf32>
    %429 = arith.mulf %427, %428 : vector<16x32xf32>
    %430 = vector.broadcast %9 : vector<1x32xf32> to vector<16x32xf32>
    %431 = arith.addf %429, %430 : vector<16x32xf32>
    %c0_125 = arith.constant 0 : index
    %c0_126 = arith.constant 0 : index
    %432 = vector.load %arg8[%c0_125, %c0_126] : memref<32x64xf32, #tpu.memory_space<vmem>>, vector<32x64xf32>
    %cst_127 = arith.constant dense<0.000000e+00> : vector<16x64xf32>
    %433 = tpu.matmul %431, %432, %cst_127 {dimension_numbers = #tpu.dot_dimension_numbers<[1], [0], [0], [1], [0, 0, 1, 1], [], []>} : vector<16x32xf32>, vector<32x64xf32>, vector<16x64xf32> -> vector<16x64xf32>
    %c0_128 = arith.constant 0 : index
    %c0_129 = arith.constant 0 : index
    %434 = vector.load %arg9[%c0_128, %c0_129] : memref<1x64xf32, #tpu.memory_space<vmem>>, vector<1x64xf32>
    %435 = vector.broadcast %434 : vector<1x64xf32> to vector<16x64xf32>
    %436 = arith.addf %433, %435 : vector<16x64xf32>
    %cst_130 = arith.constant 0.000000e+00 : f32
    %437 = vector.broadcast %cst_130 : f32 to vector<16x64xf32>
    %438 = arith.maximumf %436, %437 : vector<16x64xf32>
    %c0_131 = arith.constant 0 : index
    %c0_132 = arith.constant 0 : index
    %439 = vector.load %arg10[%c0_131, %c0_132] : memref<64x32xf32, #tpu.memory_space<vmem>>, vector<64x32xf32>
    %cst_133 = arith.constant dense<0.000000e+00> : vector<16x32xf32>
    %440 = tpu.matmul %438, %439, %cst_133 {dimension_numbers = #tpu.dot_dimension_numbers<[1], [0], [0], [1], [0, 0, 1, 1], [], []>} : vector<16x64xf32>, vector<64x32xf32>, vector<16x32xf32> -> vector<16x32xf32>
    %441 = vector.broadcast %5 : vector<1x32xf32> to vector<16x32xf32>
    %442 = arith.addf %440, %441 : vector<16x32xf32>
    %443 = arith.addf %431, %442 : vector<16x32xf32>
    %cst_134 = arith.constant dense<0.000000e+00> : vector<16xf32>
    %444 = vector.multi_reduction <add>, %443, %cst_134 [1] : vector<16x32xf32> to vector<16xf32>
    %445 = vector.shape_cast %444 : vector<16xf32> to vector<16x1xf32>
    %cst_135 = arith.constant 3.200000e+01 : f32
    %446 = vector.broadcast %cst_135 : f32 to vector<16x1xf32>
    %447 = arith.divf %445, %446 : vector<16x1xf32>
    %448 = vector.broadcast %447 : vector<16x1xf32> to vector<16x32xf32>
    %449 = arith.subf %443, %448 : vector<16x32xf32>
    %450 = arith.mulf %449, %449 : vector<16x32xf32>
    %cst_136 = arith.constant dense<0.000000e+00> : vector<16xf32>
    %451 = vector.multi_reduction <add>, %450, %cst_136 [1] : vector<16x32xf32> to vector<16xf32>
    %452 = vector.shape_cast %451 : vector<16xf32> to vector<16x1xf32>
    %cst_137 = arith.constant 3.200000e+01 : f32
    %453 = vector.broadcast %cst_137 : f32 to vector<16x1xf32>
    %454 = arith.divf %452, %453 : vector<16x1xf32>
    %455 = vector.broadcast %447 : vector<16x1xf32> to vector<16x32xf32>
    %456 = arith.subf %443, %455 : vector<16x32xf32>
    %cst_138 = arith.constant 9.99999974E-6 : f32
    %457 = vector.broadcast %cst_138 : f32 to vector<16x1xf32>
    %458 = arith.addf %454, %457 : vector<16x1xf32>
    %459 = math.rsqrt %458 : vector<16x1xf32>
    %460 = vector.broadcast %459 : vector<16x1xf32> to vector<16x32xf32>
    %461 = arith.mulf %456, %460 : vector<16x32xf32>
    %462 = vector.broadcast %10 : vector<1x32xf32> to vector<16x32xf32>
    %463 = arith.mulf %461, %462 : vector<16x32xf32>
    %464 = vector.broadcast %11 : vector<1x32xf32> to vector<16x32xf32>
    %465 = arith.addf %463, %464 : vector<16x32xf32>
    %c0_139 = arith.constant 0 : index
    %c0_140 = arith.constant 0 : index
    %466 = vector.load %arg12[%c0_139, %c0_140] : memref<16x32xf32, #tpu.memory_space<vmem>>, vector<16x32xf32>
    tpu.vector_store %arg12[%c0_139, %c0_140], %465 {strides = array<i32>} : memref<16x32xf32, #tpu.memory_space<vmem>>, vector<16x32xf32>,
    return
  }
}

</mosaic_0001>

<bundles_post_ra>
// kernel: tpu_custom_call.1
= control target key start
LH: loop header
LB: loop body
LE: loop exit
PB: predicated region body
PF: predicated region fallthrough
CT: control target
= control target key end

     0   :  { %17 = vsyncpa [#allocation3], 0  ;;  %s6040_s0 = inlined_call_operand.hbm [shape: f32[16,32], index: 0, kind: input, shape index: {}]   ;;  %s6041_s1 = inlined_call_operand.hbm [shape: f32[16,32], index: 1, kind: input, shape index: {}]   ;;  %s6042_s2 = inlined_call_operand.vmem [shape: f32[32,96], index: 2, kind: input, shape index: {}]   ;;  %s6043_s3 = inlined_call_operand.hbm [shape: f32[1,96], index: 3, kind: input, shape index: {}]   ;;  %s6044_s4 = inlined_call_operand.vmem [shape: f32[32,32], index: 4, kind: input, shape index: {}]   ;;  %s6045_s5 = inlined_call_operand.vmem [shape: f32[32,96], index: 5, kind: input, shape index: {}]   ;;  %s6046_s6 = inlined_call_operand.hbm [shape: f32[1,96], index: 6, kind: input, shape index: {}]   ;;  %s6047_s7 = inlined_call_operand.hbm [shape: f32[32,32], index: 7, kind: input, shape index: {}]   ;;  %s6048_s8 = inlined_call_operand.hbm [shape: f32[32,64], index: 8, kind: input, shape index: {}]   ;;  %s6049_s9 = inlined_call_operand.hbm [shape: f32[1,64], index: 9, kind: input, shape index: {}]   ;;  %s6050_s10 = inlined_call_operand.vmem [shape: f32[64,32], index: 10, kind: input, shape index: {}]   ;;  %s6051_s11 = inlined_call_operand.vmem [shape: f32[9,32], index: 11, kind: input, shape index: {}]   ;;  %s6052_s12 = inlined_call_operand.hbm [shape: f32[16,32], index: 12, kind: output, shape index: {}]  }
   0x1   :  { %18 = vsyncpa [#allocation6], 0 }
   0x2   :  { %19 = vsyncpa [#allocation9], 0 }
   0x3   :  { %20 = vsyncpa [#allocation12], 0 }
   0x4   :  { %21 = vsyncpa [#allocation4], 0  ;;  %s5381_s21 = smov [#allocation5]   ;;  %s5382_s23 = smov [#allocation8]  }
   0x5   :  { %s39_s22 = sshll.u32 %s5381_s21, 4  ;;  %s68_s24 = sshll.u32 %s5382_s23, 4  ;;  %s40_s22 = int_to_ptr.vmem [resolvable:$true] %s39_s22  ;;  %s69_s24 = int_to_ptr.vmem [resolvable:$true] %s68_s24 }
   0x6   :  { %s5219_s25 = scalar_lea.vmem %s40_s22, 256  ;;  %p5224_p1 = scmp.lt.s32.totalorder %s40_s22, %s40_s22 }
   0x7   :  { %p5220_p0 = scmp.ne.s32.totalorder %s40_s22, %s5219_s25  ;;  %p5225_p2 = scmp.lt.s32.totalorder %s5219_s25, %s5219_s25 }
   0x9   :  { %p5226_p3 = por %p5225_p2, %p5224_p1 }
   0xb   :  { %p5227_p4 = pnand %p5226_p3, %p5220_p0 }
   0xd   :  { %5230 = shalt.err (!%p5227_p4)
}
   0xe   :  { %s5383_s26 = smov 128   ;;  %s5384_s27 = smov 8  }
   0xf   :  { %45 = dma.hbm_to_vmem [thread:$0]  %s6041_s1, 256, %s40_s22, [#allocation6], %s5383_s26, %s5383_s26, %s5384_s27  }
  0x10   :  { %s5239_s30 = scalar_lea.vmem %s69_s24, 16  ;;  %s5243_s13 = scalar_lea.vmem %s69_s24, 32 }
  0x11   :  { %p5240_p5 = scmp.ne.s32.totalorder %s69_s24, %s5239_s30  ;;  %p5244_p6 = scmp.lt.s32.totalorder %s69_s24, %s69_s24 }
  0x12   :  { %p5245_p7 = scmp.lt.s32.totalorder %s5243_s13, %s5239_s30 }
  0x14   :  { %p5246_p8 = por %p5245_p7, %p5244_p6 }
  0x16   :  { %p5247_p9 = pnand %p5246_p8, %p5240_p5 }
  0x18   :  { %5250 = shalt.err (!%p5247_p9)
}
  0x19   :  { %71 = dma.hbm_to_vmem [thread:$0]  %s6046_s6, 16, %s69_s24, [#allocation9]  }
  0x1a   :  { %s5385_s16 = smov [#allocation11]   ;;  %s5386_s18 = smov [#allocation2]  }
  0x1b   :  { %s89_s17 = sshll.u32 %s5385_s16, 4  ;;  %s27_s19 = sshll.u32 %s5386_s18, 4  ;;  %s90_s17 = int_to_ptr.vmem [resolvable:$true] %s89_s17  ;;  %s28_s19 = int_to_ptr.vmem [resolvable:$true] %s27_s19 }
  0x1c   :  { %s5259_s20 = scalar_lea.vmem %s90_s17, 512  ;;  %p5264_p11 = scmp.lt.s32.totalorder %s90_s17, %s90_s17 }
  0x1d   :  { %p5260_p10 = scmp.ne.s32.totalorder %s90_s17, %s5259_s20  ;;  %p5265_p12 = scmp.lt.s32.totalorder %s5259_s20, %s5259_s20 }
  0x1f   :  { %p5266_p13 = por %p5265_p12, %p5264_p11 }
  0x21   :  { %p5267_p0 = pnand %p5266_p13, %p5260_p10 }
  0x23   :  { %5270 = shalt.err (!%p5267_p0)
}
  0x24   :  { %95 = dma.hbm_to_vmem [thread:$0]  %s6048_s8, 512, %s90_s17, [#allocation12], %s5383_s26, %s5383_s26, %s5384_s27  }
  0x25   :  { %s5279_s6 = scalar_lea.vmem %s28_s19, 256  ;;  %p5284_p2 = scmp.lt.s32.totalorder %s28_s19, %s28_s19 }
  0x26   :  { %p5280_p1 = scmp.ne.s32.totalorder %s28_s19, %s5279_s6  ;;  %p5285_p3 = scmp.lt.s32.totalorder %s5279_s6, %s5279_s6 }
  0x28   :  { %p5286_p4 = por %p5285_p3, %p5284_p2 }
  0x2a   :  { %p5287_p5 = pnand %p5286_p4, %p5280_p1 }
  0x2c   :  { %5290 = shalt.err (!%p5287_p5)
}
  0x2d   :  { %33 = dma.hbm_to_vmem [thread:$0]  %s6040_s0, 256, %s28_s19, [#allocation3], %s5383_s26, %s5383_s26, %s5384_s27  }
  0x2e   :  { %s5387_s24 = smov [#allocation7]   ;;  %s5388_s28 = smov [#allocation10]  }
  0x2f   :  { %s54_s25 = sshll.u32 %s5387_s24, 4  ;;  %s77_s29 = sshll.u32 %s5388_s28, 4  ;;  %s55_s25 = int_to_ptr.vmem [resolvable:$true] %s54_s25  ;;  %s78_s29 = int_to_ptr.vmem [resolvable:$true] %s77_s29 }
  0x30   :  { %s5299_s8 = scalar_lea.vmem %s55_s25, 16  ;;  %s5303_s30 = scalar_lea.vmem %s55_s25, 32 }
  0x31   :  { %p5300_p6 = scmp.ne.s32.totalorder %s55_s25, %s5299_s8  ;;  %p5304_p7 = scmp.lt.s32.totalorder %s55_s25, %s55_s25 }
  0x32   :  { %p5305_p8 = scmp.lt.s32.totalorder %s5303_s30, %s5299_s8 }
  0x34   :  { %p5306_p9 = por %p5305_p8, %p5304_p7 }
  0x36   :  { %p5307_p10 = pnand %p5306_p9, %p5300_p6 }
  0x38   :  { %5310 = shalt.err (!%p5307_p10)
}
  0x39   :  { %57 = dma.hbm_to_vmem [thread:$0]  %s6043_s3, 16, %s55_s25, [#allocation6]  }
  0x3a   :  { %s5319_s15 = scalar_lea.vmem %s78_s29, 512  ;;  %p5324_p12 = scmp.lt.s32.totalorder %s78_s29, %s78_s29 }
  0x3b   :  { %p5320_p11 = scmp.ne.s32.totalorder %s78_s29, %s5319_s15  ;;  %p5325_p13 = scmp.lt.s32.totalorder %s5319_s15, %s5319_s15 }
  0x3d   :  { %p5326_p0 = por %p5325_p13, %p5324_p12 }
  0x3f   :  { %p5327_p1 = pnand %p5326_p0, %p5320_p11 }
  0x41   :  { %5330 = shalt.err (!%p5327_p1)
}
  0x42   :  { %83 = dma.hbm_to_vmem [thread:$0]  %s6047_s7, 512, %s78_s29, [#allocation9], %s5383_s26, %s5383_s26, %s5384_s27  }
  0x43   :  { %s5389_s17 = smov [#allocation13]  }
  0x44   :  { %s102_s18 = sshll.u32 %s5389_s17, 4  ;;  %s103_s18 = int_to_ptr.vmem [resolvable:$true] %s102_s18 }
  0x45   :  { %s5339_s19 = scalar_lea.vmem %s103_s18, 16  ;;  %s5343_s3 = scalar_lea.vmem %s103_s18, 32 }
  0x46   :  { %p5340_p2 = scmp.ne.s32.totalorder %s103_s18, %s5339_s19  ;;  %p5344_p3 = scmp.lt.s32.totalorder %s103_s18, %s103_s18 }
  0x47   :  { %p5345_p4 = scmp.lt.s32.totalorder %s5343_s3, %s5339_s19 }
  0x49   :  { %p5346_p5 = por %p5345_p4, %p5344_p3 }
  0x4b   :  { %p5347_p6 = pnand %p5346_p5, %p5340_p2 }
  0x4d   :  { %5350 = shalt.err (!%p5347_p6)
}
  0x4e   :  { %105 = dma.hbm_to_vmem [thread:$0]  %s6049_s9, 16, %s103_s18, [#allocation12]  }
  0x4f   :  { %5371 = dma.done.wait [#allocation3], 256  }
  0x50   :  { %5372 = vsyncadd [#allocation3], 4294967040 }
  0x51   :  { %5373 = dma.done.wait [#allocation6], 272  }
  0x52   :  { %5374 = vsyncadd [#allocation6], 4294967024 }
  0x53   :  { %5375 = dma.done.wait [#allocation9], 528  }
  0x54   :  { %5376 = vsyncadd [#allocation9], 4294966768 }
  0x55   :  { %5377 = dma.done.wait [#allocation12], 528  }
  0x56   :  { %5378 = vsyncadd [#allocation12], 4294966768  ;;  %vm148_vm0 = vcmask 261120   ;;  %v140_v0 = vld [vmem:[%s6042_s2 + $0x18] sm:$0xff]  ;;  %v139_v1 = vld [vmem:[%s6042_s2 + $0x10] sm:$0xff]  ;;  %v5390_v6 = vmov 0.0  }
  0x57   :  { %4808 = vmatprep.subr.mxu0 %v140_v0  ;;  %v5508_v2 = vld [vmem:[#allocation2] sm:$0xff]  ;;  %v138_v3 = vld [vmem:[%s6042_s2 + $0x8] sm:$0xff]  ;;  %4824 = vmatprep.subr.mxu1 %v5390_v6  ;;  %vm5391_vm1 = vmmov 0   ;;  %s5393_s28 = smov 96   ;;  %s5394_s29 = smov 88   ;;  %vm237_vm2 = vcmask 64512  }
  0x58   :  { %4809 = vmatpush3.msra.mxu0 %v140_v0  ;;  %4816 = vmatprep.mubr.msk.f32.mxu0 %vm148_vm0, %v5508_v2  ;;  %v137_v4 = vld [vmem:[%s6042_s2] sm:$0xff]  ;;  %v5518_v5 = vld [vmem:[#allocation2 + $0x8] sm:$0xff]  ;;  %s5392_s2 = smov 120   ;;  %s5395_s8 = smov 56   ;;  %vm4456_vm3 = vcmask 523264  }
  0x59   :  { %4810 = vmatprep.subr.mxu0 %v139_v1  ;;  %4826 = vmatprep.mubr.msk.f32.mxu1 %vm5391_vm1, %v5390_v6  ;;  %v4600_v7 = vld [vmem:[#allocation7] ss:$0 sm:$0xff]  ;;  %s5396_s30 = smov 64   ;;  %s5397_s13 = smov 80   ;;  %v5578_v42 = vld [vmem:[%s6044_s4 + $0x8] sm:$0xff] }
  0x5a   :  { %4811 = vmatpush3.msra.mxu0 %v139_v1  ;;  %s5398_s14 = smov 112   ;;  %v5572_v41 = vld [vmem:[%s6044_s4] sm:$0xff]  ;;  %s5399_s18 = smov 72  }
  0x5b   :  { %4812 = vmatprep.subr.mxu0 %v138_v3  ;;  %s5400_s19 = smov 104   ;;  %s5401_s3 = smov 48  }
  0x5c   :  { %4813 = vmatpush3.msra.mxu0 %v138_v3  ;;  %s5402_s7 = smov 40   ;;  %s5403_s23 = smov [#allocation14]  }
  0x5d   :  { %4814 = vmatprep.subr.mxu0 %v137_v4  ;;  %s4585_s24 = sshll.u32 %s5403_s23, 4  ;;  %s4586_s24 = int_to_ptr.vmem [resolvable:$true] %s4585_s24 }
  0x5e   :  { %4815 = vmatpush3.msra.mxu0 %v137_v4  ;;  %s5351_s25 = scalar_lea.vmem %s4586_s24, 256  ;;  %p5356_p8 = scmp.lt.s32.totalorder %s4586_s24, %s4586_s24 }
  0x5f   :  { %4817 = vmatmul.mubr.msk.f32.vlgmr.msra.gmra.mxu0 %vm148_vm0, %v5518_v5  ;;  %4819 = vmatprep.subr.mxu0 %v5390_v6  ;;  %p5352_p7 = scmp.ne.s32.totalorder %s4586_s24, %s5351_s25  ;;  %p5357_p9 = scmp.lt.s32.totalorder %s5351_s25, %s5351_s25 }
  0x60   :  { %4821 = vmatprep.mubr.msk.f32.mxu0 %vm5391_vm1, %v5390_v6 }
  0x61   :  { %p5358_p10 = por %p5357_p9, %p5356_p8 }
  0x63   :  { %p5359_p11 = pnand %p5358_p10, %p5352_p7 }
 0x11f   :  { %v4818_v8 = vpop.f32.mrf.mxu0 }
 0x120   :  { %v5528_v9 = vadd.f32 %v4818_v8, %v4600_v7  ;;  %v5618_v8 = vld [vmem:[%s6044_s4 + $0x10] sm:$0xff] }
 0x121   :  { %v221_v10 = vpop.f32.mrf.mxu0 }
 0x122   :  { %v5530_v11 = vadd.f32 %v4600_v7, %v221_v10 }
 0x124   :  { %400 = vrot.lane.b32.xlu1 %v5530_v11, %s5392_s2  ;;  %235 = vrot.lane.b32.xlu0 %v5530_v11, %s5393_s28 }
 0x128   :  { %402 = vrot.lane.b32.xlu0 %v5530_v11, %s5394_s29 }
 0x196   :  { %v236_v12 = vpop.permute.xlu0 %235  ;;  %v401_v14 = vpop.permute.xlu1 %400 }
 0x197   :  { %4820 = vmatpush3.xpose.msk.msra.mxu0 %vm237_vm2, %v236_v12 }
 0x198   :  { %4829 = vmatprep.subr.mxu0 %v5390_v6 }
 0x19a   :  { %4822 = vmatmul.mubr.msk.f32.vlgmr.msra.gmra.mxu0 %vm237_vm2, %v5530_v11  ;;  %v403_v13 = vpop.permute.xlu0 %402 }
 0x19b   :  { %4830 = vmatpush3.xpose.msk.msra.mxu0 %vm237_vm2, %v403_v13  ;;  %4831 = vmatprep.mubr.msk.f32.mxu0 %vm5391_vm1, %v5390_v6 }
 0x19c   :  { %4839 = vmatprep.subr.mxu0 %v5390_v6 }
 0x19e   :  { %4832 = vmatmul.mubr.msk.f32.vlgmr.msra.gmra.mxu0 %vm237_vm2, %v401_v14 }
 0x19f   :  { %4841 = vmatprep.mubr.msk.f32.mxu0 %vm5391_vm1, %v5390_v6  ;;  %4840 = vmatpush3.msra.mxu0 %v5578_v42 }
 0x1a0   :  { %4849 = vmatprep.subr.mxu0 %v5390_v6 }
 0x25a   :  { %v308_v15 = vpop.f32.mrf.mxu0 }
 0x25b   :  { %v312_v16 = vmul.f32 0.35355338, %v308_v15 }
 0x25c   :  { %v4823_v17 = vpop.f32.mrf.mxu0 }
 0x25d   :  { %v313_v18 = vsel %vm237_vm2, %v312_v16, -inf }
 0x25e   :  { %314 = vmax.xlane.f32.xlu1 %v313_v18  ;;  %v474_v19 = vpop.f32.mrf.mxu0 }
 0x25f   :  { %v478_v20 = vmul.f32 0.35355338, %v474_v19 }
 0x260   :  { %v4833_v21 = vpop.f32.mrf.mxu0 }
 0x261   :  { %v479_v22 = vsel %vm237_vm2, %v478_v20, -inf }
 0x262   :  { %480 = vmax.xlane.f32.xlu0 %v479_v22 }
 0x2e7   :  { %v315_v23 = vpop.xlane.xlu1 %314 }
 0x2e8   :  { %v316_v24 = vsub.f32 %v312_v16, %v315_v23 }
 0x2ea   :  { %v317_v25 = vmul.f32 1.442695, %v316_v24 }
 0x2eb   :  { %v481_v26 = vpop.xlane.xlu0 %480 }
 0x2ec   :  { %5134 = vpow2.f32 %v317_v25  ;;  %v482_v27 = vsub.f32 %v478_v20, %v481_v26 }
 0x2ee   :  { %v483_v28 = vmul.f32 1.442695, %v482_v27 }
 0x2f0   :  { %5136 = vpow2.f32 %v483_v28 }
 0x2f9   :  { %v5135_v29 = vpop.eup %5134 }
 0x2fa   :  { %v319_v30 = vsel %vm237_vm2, %v5135_v29, 0.0 }
 0x2fb   :  { %320 = vadd.xlane.f32.xlu0 %v319_v30 }
 0x2fd   :  { %v5137_v31 = vpop.eup %5136 }
 0x2fe   :  { %v485_v32 = vsel %vm237_vm2, %v5137_v31, 0.0 }
 0x2ff   :  { %486 = vadd.xlane.f32.xlu1 %v485_v32 }
 0x310   :  { %490 = vrot.lane.b32.xlu1 %v5530_v11, %s5395_s8 }
 0x311   :  { %324 = vrot.lane.b32.xlu0 %v5530_v11, %s5396_s30 }
 0x314   :  { %714 = vrot.lane.b32.xlu1 %v5530_v11, %s5397_s13 }
 0x315   :  { %712 = vrot.lane.b32.xlu0 %v5530_v11, %s5398_s14 }
 0x384   :  { %v321_v33 = vpop.xlane.xlu0 %320 }
 0x385   :  { %5138 = vrcp.f32 %v321_v33 }
 0x388   :  { %v487_v34 = vpop.xlane.xlu1 %486  ;;  %v325_v35 = vpop.permute.xlu0 %324 }
 0x389   :  { %5140 = vrcp.f32 %v487_v34  ;;  %4825 = vmatpush3.msra.mxu1 %v325_v35 }
 0x38a   :  { %4834 = vmatprep.subr.mxu1 %v5390_v6 }
 0x38c   :  { %v491_v38 = vpop.permute.xlu1 %490  ;;  %v713_v48 = vpop.permute.xlu0 %712 }
 0x390   :  { %v715_v46 = vpop.permute.xlu1 %714 }
 0x392   :  { %v5139_v36 = vpop.eup %5138 }
 0x393   :  { %v323_v37 = vmul.f32 %v5139_v36, %v5135_v29 }
 0x395   :  { %4827 = vmatmul.mubr.msk.f32.vlgmr.msra.gmra.mxu1 %vm237_vm2, %v323_v37 }
 0x396   :  { %v5141_v39 = vpop.eup %5140  ;;  %4835 = vmatpush3.msra.mxu1 %v491_v38  ;;  %4836 = vmatprep.mubr.msk.f32.mxu1 %vm5391_vm1, %v5390_v6 }
 0x397   :  { %v489_v40 = vmul.f32 %v5141_v39, %v5137_v31  ;;  %4844 = vmatprep.subr.mxu1 %v5390_v6  ;;  %v5654_v31 = vld [vmem:[%s6044_s4 + $0x18] sm:$0xff] }
 0x399   :  { %4837 = vmatmul.mubr.msk.f32.vlgmr.msra.gmra.mxu1 %vm237_vm2, %v489_v40 }
 0x39a   :  { %4846 = vmatprep.mubr.msk.f32.mxu1 %vm5391_vm1, %v5390_v6  ;;  %4845 = vmatpush3.msra.mxu1 %v5572_v41 }
 0x39b   :  { %4854 = vmatprep.subr.mxu1 %v5390_v6 }
 0x455   :  { %v396_v43 = vpop.f32.mrf.mxu1 }
 0x456   :  { %4847 = vmatmul.mubr.msk.f32.vlgmr.msra.gmra.mxu1 %vm237_vm2, %v396_v43 }
 0x457   :  { %v4828_v44 = vpop.f32.mrf.mxu1  ;;  %4856 = vmatprep.mubr.msk.f32.mxu1 %vm5391_vm1, %v5390_v6 }
 0x459   :  { %v562_v45 = vpop.f32.mrf.mxu1 }
 0x45a   :  { %4842 = vmatmul.mubr.msk.f32.vlgmr.msra.gmra.mxu0 %vm237_vm2, %v562_v45 }
 0x45b   :  { %4850 = vmatpush3.xpose.msk.msra.mxu0 %vm237_vm2, %v715_v46  ;;  %v4838_v47 = vpop.f32.mrf.mxu1  ;;  %4851 = vmatprep.mubr.msk.f32.mxu0 %vm5391_vm1, %v5390_v6 }
 0x45c   :  { %4859 = vmatprep.subr.mxu0 %v5390_v6 }
 0x45e   :  { %4852 = vmatmul.mubr.msk.f32.vlgmr.msra.gmra.mxu0 %vm237_vm2, %v713_v48 }
 0x45f   :  { %4861 = vmatprep.mubr.msk.f32.mxu0 %vm5391_vm1, %v5390_v6  ;;  %4860 = vmatpush3.msra.mxu0 %v5618_v8 }
 0x460   :  { %4869 = vmatprep.subr.mxu0 %v5390_v6 }
 0x516   :  { %v708_v49 = vpop.f32.mrf.mxu1 }
 0x518   :  { %v4848_v50 = vpop.f32.mrf.mxu1 }
 0x51a   :  { %v635_v51 = vpop.f32.mrf.mxu0 }
 0x51b   :  { %v5594_v52 = vadd.f32 %v708_v49, %v635_v51 }
 0x51c   :  { %v4843_v53 = vpop.f32.mrf.mxu0 }
 0x51e   :  { %v786_v54 = vpop.f32.mrf.mxu0 }
 0x51f   :  { %v790_v55 = vmul.f32 0.35355338, %v786_v54 }
 0x520   :  { %v4853_v56 = vpop.f32.mrf.mxu0 }
 0x521   :  { %v791_v57 = vsel %vm237_vm2, %v790_v55, -inf }
 0x522   :  { %792 = vmax.xlane.f32.xlu1 %v791_v57 }
 0x533   :  { %954 = vrot.lane.b32.xlu1 %v5530_v11, %s5399_s18 }
 0x537   :  { %952 = vrot.lane.b32.xlu1 %v5530_v11, %s5400_s19 }
 0x53b   :  { %1193 = vrot.lane.b32.xlu1 %v5528_v9, %s5393_s28 }
 0x5ab   :  { %v793_v58 = vpop.xlane.xlu1 %792 }
 0x5ac   :  { %v794_v59 = vsub.f32 %v790_v55, %v793_v58 }
 0x5ae   :  { %v795_v60 = vmul.f32 1.442695, %v794_v59 }
 0x5af   :  { %v955_v3 = vpop.permute.xlu1 %954 }
 0x5b0   :  { %5142 = vpow2.f32 %v795_v60 }
 0x5b3   :  { %v953_v7 = vpop.permute.xlu1 %952 }
 0x5b7   :  { %v1194_v25 = vpop.permute.xlu1 %1193 }
 0x5bd   :  { %v5143_v61 = vpop.eup %5142 }
 0x5be   :  { %v797_v62 = vsel %vm237_vm2, %v5143_v61, 0.0 }
 0x5bf   :  { %798 = vadd.xlane.f32.xlu0 %v797_v62 }
 0x5d5   :  { %802 = vrot.lane.b32.xlu0 %v5530_v11, %s5401_s3 }
 0x648   :  { %v799_v63 = vpop.xlane.xlu0 %798 }
 0x649   :  { %5144 = vrcp.f32 %v799_v63 }
 0x64c   :  { %v803_v0 = vpop.permute.xlu0 %802 }
 0x64d   :  { %4855 = vmatpush3.msra.mxu1 %v803_v0 }
 0x64e   :  { %4864 = vmatprep.subr.mxu1 %v5390_v6 }
 0x656   :  { %v5145_v1 = vpop.eup %5144 }
 0x657   :  { %v801_v4 = vmul.f32 %v5145_v1, %v5143_v61 }
 0x659   :  { %4857 = vmatmul.mubr.msk.f32.vlgmr.msra.gmra.mxu1 %vm237_vm2, %v801_v4 }
 0x65a   :  { %4865 = vmatpush3.xpose.msk.msra.mxu1 %vm237_vm2, %v955_v3  ;;  %4866 = vmatprep.mubr.msk.f32.mxu1 %vm5391_vm1, %v5390_v6 }
 0x65b   :  { %4874 = vmatprep.subr.mxu1 %v5390_v6 }
 0x65d   :  { %4867 = vmatmul.mubr.msk.f32.vlgmr.msra.gmra.mxu1 %vm237_vm2, %v953_v7 }
 0x65e   :  { %4876 = vmatprep.mubr.msk.f32.mxu1 %vm5391_vm1, %v5390_v6  ;;  %4875 = vmatpush3.msra.mxu1 %v5654_v31 }
 0x65f   :  { %4884 = vmatprep.subr.mxu1 %v5390_v6 }
 0x719   :  { %v874_v10 = vpop.f32.mrf.mxu1 }
 0x71a   :  { %4862 = vmatmul.mubr.msk.f32.vlgmr.msra.gmra.mxu0 %vm237_vm2, %v874_v10 }
 0x71b   :  { %v4858_v12 = vpop.f32.mrf.mxu1  ;;  %4871 = vmatprep.mubr.msk.f32.mxu0 %vm5391_vm1, %v5390_v6 }
 0x71d   :  { %v1026_v13 = vpop.f32.mrf.mxu1 }
 0x71e   :  { %v1030_v14 = vmul.f32 0.35355338, %v1026_v13 }
 0x71f   :  { %v4868_v15 = vpop.f32.mrf.mxu1 }
 0x720   :  { %v1031_v16 = vsel %vm237_vm2, %v1030_v14, -inf }
 0x721   :  { %1032 = vmax.xlane.f32.xlu0 %v1031_v16 }
 0x737   :  { %1042 = vrot.lane.b32.xlu0 %v5530_v11, %s5402_s7 }
 0x73b   :  { %1359 = vrot.lane.b32.xlu0 %v5528_v9, %s5394_s29 }
 0x7aa   :  { %v1033_v17 = vpop.xlane.xlu0 %1032 }
 0x7ab   :  { %v1034_v18 = vsub.f32 %v1030_v14, %v1033_v17 }
 0x7ad   :  { %v1035_v19 = vmul.f32 1.442695, %v1034_v18 }
 0x7ae   :  { %v1043_v20 = vpop.permute.xlu0 %1042 }
 0x7af   :  { %5146 = vpow2.f32 %v1035_v19  ;;  %4870 = vmatpush3.msra.mxu0 %v1043_v20 }
 0x7b0   :  { %4879 = vmatprep.subr.mxu0 %v5390_v6 }
 0x7b2   :  { %v1360_v29 = vpop.permute.xlu0 %1359 }
 0x7bc   :  { %v5147_v21 = vpop.eup %5146 }
 0x7bd   :  { %v1037_v22 = vsel %vm237_vm2, %v5147_v21, 0.0 }
 0x7be   :  { %1038 = vadd.xlane.f32.xlu1 %v1037_v22 }
 0x7cf   :  { %1357 = vrot.lane.b32.xlu1 %v5528_v9, %s5392_s2 }
 0x7da   :  { %v947_v23 = vpop.f32.mrf.mxu0 }
 0x7db   :  { %v951_v11 = vadd.f32 %v947_v23, %v5594_v52 }
 0x7dc   :  { %v4863_v24 = vpop.f32.mrf.mxu0 }
 0x847   :  { %v1039_v26 = vpop.xlane.xlu1 %1038 }
 0x848   :  { %5148 = vrcp.f32 %v1039_v26 }
 0x84b   :  { %v1358_v30 = vpop.permute.xlu1 %1357 }
 0x855   :  { %v5149_v27 = vpop.eup %5148 }
 0x856   :  { %v1041_v28 = vmul.f32 %v5149_v27, %v5147_v21 }
 0x858   :  { %4872 = vmatmul.mubr.msk.f32.vlgmr.msra.gmra.mxu0 %vm237_vm2, %v1041_v28 }
 0x859   :  { %4880 = vmatpush3.xpose.msk.msra.mxu0 %vm237_vm2, %v1194_v25  ;;  %4881 = vmatprep.mubr.msk.f32.mxu0 %vm5391_vm1, %v5390_v6 }
 0x85a   :  { %4889 = vmatprep.subr.mxu0 %v5390_v6 }
 0x85c   :  { %4882 = vmatmul.mubr.msk.f32.vlgmr.msra.gmra.mxu0 %vm237_vm2, %v5528_v9 }
 0x85d   :  { %4890 = vmatpush3.xpose.msk.msra.mxu0 %vm237_vm2, %v1360_v29  ;;  %4891 = vmatprep.mubr.msk.f32.mxu0 %vm5391_vm1, %v5390_v6  ;;  %v2149_v29 = vlaneseq }
 0x85e   :  { %4899 = vmatprep.subr.mxu0 %v5390_v6 }
 0x860   :  { %4892 = vmatmul.mubr.msk.f32.vlgmr.msra.gmra.mxu0 %vm237_vm2, %v1358_v30  ;;  %v5716_v30 = vshrl.u32 %v2149_v29, 7 }
 0x861   :  { %4900 = vmatpush3.msra.mxu0 %v5578_v42  ;;  %4901 = vmatprep.mubr.msk.f32.mxu0 %vm5391_vm1, %v5390_v6 }
 0x862   :  { %4909 = vmatprep.subr.mxu0 %v5390_v6 }
 0x918   :  { %v1114_v32 = vpop.f32.mrf.mxu0 }
 0x919   :  { %4877 = vmatmul.mubr.msk.f32.vlgmr.msra.gmra.mxu1 %vm237_vm2, %v1114_v32  ;;  %v2151_v32 = vsub.s32 0, %v5716_v30 }
 0x91a   :  { %v4873_v33 = vpop.f32.mrf.mxu0  ;;  %4886 = vmatprep.mubr.msk.f32.mxu1 %vm5391_vm1, %v5390_v6 }
 0x91b   :  { %v5722_v33 = vld [vmem:[%s6051_s11] sm:$0xff] }
 0x91c   :  { %v1265_v34 = vpop.f32.mrf.mxu0 }
 0x91d   :  { %v1269_v35 = vmul.f32 0.35355338, %v1265_v34  ;;  %v2152_v34 = vrot.slane %v5722_v33, %v2151_v32 }
 0x91e   :  { %v4883_v36 = vpop.f32.mrf.mxu0 }
 0x91f   :  { %v1270_v37 = vsel %vm237_vm2, %v1269_v35, -inf }
 0x920   :  { %1271 = vmax.xlane.f32.xlu0 %v1270_v37  ;;  %v1431_v38 = vpop.f32.mrf.mxu0 }
 0x921   :  { %v1435_v39 = vmul.f32 0.35355338, %v1431_v38 }
 0x922   :  { %v4893_v40 = vpop.f32.mrf.mxu0 }
 0x923   :  { %v1436_v42 = vsel %vm237_vm2, %v1435_v39, -inf }
 0x924   :  { %1437 = vmax.xlane.f32.xlu1 %v1436_v42 }
 0x935   :  { %1281 = vrot.lane.b32.xlu1 %v5528_v9, %s5396_s30 }
 0x939   :  { %1671 = vrot.lane.b32.xlu1 %v5528_v9, %s5397_s13 }
 0x93d   :  { %1669 = vrot.lane.b32.xlu1 %v5528_v9, %s5398_s14 }
 0x9a9   :  { %v1272_v43 = vpop.xlane.xlu0 %1271 }
 0x9aa   :  { %v1273_v44 = vsub.f32 %v1269_v35, %v1272_v43 }
 0x9ac   :  { %v1274_v45 = vmul.f32 1.442695, %v1273_v44 }
 0x9ad   :  { %v1438_v46 = vpop.xlane.xlu1 %1437 }
 0x9ae   :  { %5150 = vpow2.f32 %v1274_v45  ;;  %v1439_v47 = vsub.f32 %v1435_v39, %v1438_v46 }
 0x9b0   :  { %v1440_v48 = vmul.f32 1.442695, %v1439_v47 }
 0x9b1   :  { %v1282_v49 = vpop.permute.xlu1 %1281 }
 0x9b2   :  { %5152 = vpow2.f32 %v1440_v48  ;;  %4885 = vmatpush3.msra.mxu1 %v1282_v49 }
 0x9b3   :  { %4894 = vmatprep.subr.mxu1 %v5390_v6 }
 0x9b5   :  { %v1672_v1 = vpop.permute.xlu1 %1671 }
 0x9bb   :  { %v5151_v50 = vpop.eup %5150 }
 0x9bc   :  { %v1276_v51 = vsel %vm237_vm2, %v5151_v50, 0.0 }
 0x9bd   :  { %1277 = vadd.xlane.f32.xlu0 %v1276_v51 }
 0x9bf   :  { %v5153_v52 = vpop.eup %5152 }
 0x9c0   :  { %v1442_v53 = vsel %vm237_vm2, %v5153_v52, 0.0 }
 0x9c1   :  { %1443 = vadd.xlane.f32.xlu0 %v1442_v53 }
 0x9d7   :  { %1447 = vrot.lane.b32.xlu0 %v5528_v9, %s5395_s8 }
 0x9d9   :  { %v1187_v54 = vpop.f32.mrf.mxu1 }
 0x9da   :  { %v5674_v55 = vadd.f32 %v1187_v54, %v951_v11 }
 0x9db   :  { %v4878_v56 = vpop.f32.mrf.mxu1 }
 0xa46   :  { %v1278_v57 = vpop.xlane.xlu0 %1277 }
 0xa47   :  { %5154 = vrcp.f32 %v1278_v57 }
 0xa4a   :  { %v1444_v58 = vpop.xlane.xlu0 %1443 }
 0xa4b   :  { %5156 = vrcp.f32 %v1444_v58 }
 0xa4e   :  { %v1448_v61 = vpop.permute.xlu0 %1447 }
 0xa54   :  { %v5155_v59 = vpop.eup %5154 }
 0xa55   :  { %v1280_v60 = vmul.f32 %v5155_v59, %v5151_v50 }
 0xa57   :  { %4887 = vmatmul.mubr.msk.f32.vlgmr.msra.gmra.mxu1 %vm237_vm2, %v1280_v60 }
 0xa58   :  { %v5157_v62 = vpop.eup %5156  ;;  %4895 = vmatpush3.msra.mxu1 %v1448_v61  ;;  %4896 = vmatprep.mubr.msk.f32.mxu1 %vm5391_vm1, %v5390_v6 }
 0xa59   :  { %v1446_v63 = vmul.f32 %v5157_v62, %v5153_v52  ;;  %4904 = vmatprep.subr.mxu1 %v5390_v6 }
 0xa5b   :  { %4897 = vmatmul.mubr.msk.f32.vlgmr.msra.gmra.mxu1 %vm237_vm2, %v1446_v63 }
 0xa5c   :  { %4905 = vmatpush3.msra.mxu1 %v5572_v41  ;;  %4906 = vmatprep.mubr.msk.f32.mxu1 %vm5391_vm1, %v5390_v6  ;;  %v1670_v41 = vpop.permute.xlu1 %1669 }
 0xa5d   :  { %4914 = vmatprep.subr.mxu1 %v5390_v6 }
 0xb17   :  { %v1353_v0 = vpop.f32.mrf.mxu1 }
 0xb18   :  { %4907 = vmatmul.mubr.msk.f32.vlgmr.msra.gmra.mxu1 %vm237_vm2, %v1353_v0 }
 0xb19   :  { %v4888_v3 = vpop.f32.mrf.mxu1  ;;  %4916 = vmatprep.mubr.msk.f32.mxu1 %vm5391_vm1, %v5390_v6 }
 0xb1b   :  { %v1519_v4 = vpop.f32.mrf.mxu1 }
 0xb1c   :  { %4902 = vmatmul.mubr.msk.f32.vlgmr.msra.gmra.mxu0 %vm237_vm2, %v1519_v4  ;;  %v2199_v4 = vld [vmem:[%s6045_s5 + $0x18] sm:$0xff] }
 0xb1d   :  { %4910 = vmatpush3.xpose.msk.msra.mxu0 %vm237_vm2, %v1672_v1  ;;  %v4898_v7 = vpop.f32.mrf.mxu1  ;;  %4911 = vmatprep.mubr.msk.f32.mxu0 %vm5391_vm1, %v5390_v6 }
 0xb1e   :  { %4919 = vmatprep.subr.mxu0 %v5390_v6  ;;  %v2198_v7 = vld [vmem:[%s6045_s5 + $0x10] sm:$0xff] }
 0xb20   :  { %4912 = vmatmul.mubr.msk.f32.vlgmr.msra.gmra.mxu0 %vm237_vm2, %v1670_v41  ;;  %v2196_v41 = vld [vmem:[%s6045_s5] sm:$0xff] }
 0xb21   :  { %4920 = vmatpush3.msra.mxu0 %v5618_v8  ;;  %4921 = vmatprep.mubr.msk.f32.mxu0 %vm5391_vm1, %v5390_v6 }
 0xb22   :  { %4929 = vmatprep.subr.mxu0 %v5390_v6 }
 0xbd8   :  { %v1665_v10 = vpop.f32.mrf.mxu1 }
 0xbda   :  { %v4908_v12 = vpop.f32.mrf.mxu1 }
 0xbdc   :  { %v1592_v13 = vpop.f32.mrf.mxu0 }
 0xbdd   :  { %v1666_v14 = vadd.f32 %v1665_v10, %v1592_v13 }
 0xbde   :  { %v4903_v15 = vpop.f32.mrf.mxu0 }
 0xbe0   :  { %v1743_v16 = vpop.f32.mrf.mxu0 }
 0xbe1   :  { %v1747_v17 = vmul.f32 0.35355338, %v1743_v16 }
 0xbe2   :  { %v4913_v18 = vpop.f32.mrf.mxu0 }
 0xbe3   :  { %v1748_v19 = vsel %vm237_vm2, %v1747_v17, -inf }
 0xbe4   :  { %1749 = vmax.xlane.f32.xlu0 %v1748_v19  ;;  %v2186_v19 = vsub.s32 3, %v5716_v30 }
 0xbfa   :  { %1759 = vrot.lane.b32.xlu0 %v5528_v9, %s5401_s3 }
 0xbfe   :  { %1909 = vrot.lane.b32.xlu0 %v5528_v9, %s5400_s19 }
 0xc6d   :  { %v1750_v8 = vpop.xlane.xlu0 %1749 }
 0xc6e   :  { %v1751_v20 = vsub.f32 %v1747_v17, %v1750_v8  ;;  %v2192_v8 = vsub.s32 4, %v5716_v30 }
 0xc70   :  { %v1752_v21 = vmul.f32 1.442695, %v1751_v20  ;;  %v2187_v20 = vrot.slane %v5722_v33, %v2186_v19 }
 0xc71   :  { %v1760_v22 = vpop.permute.xlu0 %1759 }
 0xc72   :  { %5158 = vpow2.f32 %v1752_v21  ;;  %4915 = vmatpush3.msra.mxu1 %v1760_v22 }
 0xc73   :  { %4924 = vmatprep.subr.mxu1 %v5390_v6 }
 0xc75   :  { %v1910_v28 = vpop.permute.xlu0 %1909 }
 0xc7f   :  { %v5159_v23 = vpop.eup %5158 }
 0xc80   :  { %v1754_v11 = vsel %vm237_vm2, %v5159_v23, 0.0 }
 0xc81   :  { %1755 = vadd.xlane.f32.xlu1 %v1754_v11 }
 0xc92   :  { %1911 = vrot.lane.b32.xlu1 %v5528_v9, %s5399_s18 }
 0xd0a   :  { %v1756_v24 = vpop.xlane.xlu1 %1755 }
 0xd0b   :  { %5160 = vrcp.f32 %v1756_v24 }
 0xd0e   :  { %v1912_v27 = vpop.permute.xlu1 %1911 }
 0xd18   :  { %v5161_v25 = vpop.eup %5160 }
 0xd19   :  { %v1758_v26 = vmul.f32 %v5161_v25, %v5159_v23  ;;  %v2193_v23 = vrot.slane %v5722_v33, %v2192_v8  ;;  %v133_v25 = vld [vmem:[#allocation5] sm:$0xff] }
 0xd1b   :  { %4917 = vmatmul.mubr.msk.f32.vlgmr.msra.gmra.mxu1 %vm237_vm2, %v1758_v26  ;;  %v5767_v26 = vld [vmem:[#allocation8] ss:$0 sm:$0xff] }
 0xd1c   :  { %4925 = vmatpush3.xpose.msk.msra.mxu1 %vm237_vm2, %v1912_v27  ;;  %4926 = vmatprep.mubr.msk.f32.mxu1 %vm5391_vm1, %v5390_v6 }
 0xd1d   :  { %4934 = vmatprep.subr.mxu1 %v5390_v6 }
 0xd1f   :  { %4927 = vmatmul.mubr.msk.f32.vlgmr.msra.gmra.mxu1 %vm237_vm2, %v1910_v28 }
 0xd20   :  { %4935 = vmatpush3.msra.mxu1 %v5654_v31  ;;  %4936 = vmatprep.mubr.msk.f32.mxu1 %vm5391_vm1, %v5390_v6  ;;  %v2153_v31 = vadd.f32 %v2152_v34, %v5674_v55 }
 0xd22   :  { %v2155_v42 = vadd.f32 %v2153_v31, %v5508_v2  ;;  %v134_v31 = vld [vmem:[#allocation5 + $0x8] sm:$0xff] }
 0xd24   :  { %v2157_v43 = vsel %vm148_vm0, %v2155_v42, 0.0 }
 0xddb   :  { %v1831_v35 = vpop.f32.mrf.mxu1 }
 0xddc   :  { %4922 = vmatmul.mubr.msk.f32.vlgmr.msra.gmra.mxu0 %vm237_vm2, %v1831_v35 }
 0xddd   :  { %v4918_v36 = vpop.f32.mrf.mxu1  ;;  %4931 = vmatprep.mubr.msk.f32.mxu0 %vm5391_vm1, %v5390_v6 }
 0xddf   :  { %v1983_v37 = vpop.f32.mrf.mxu1 }
 0xde0   :  { %v1987_v38 = vmul.f32 0.35355338, %v1983_v37 }
 0xde1   :  { %v4928_v39 = vpop.f32.mrf.mxu1 }
 0xde2   :  { %v1988_v40 = vsel %vm237_vm2, %v1987_v38, -inf }
 0xde3   :  { %1989 = vmax.xlane.f32.xlu1 %v1988_v40 }
 0xde7   :  { %2158 = vadd.xlane.f32.xlu1 %v2157_v43 }
 0xe6c   :  { %v1990_v44 = vpop.xlane.xlu1 %1989 }
 0xe6d   :  { %v1991_v45 = vsub.f32 %v1987_v38, %v1990_v44 }
 0xe6f   :  { %v1992_v46 = vmul.f32 1.442695, %v1991_v45 }
 0xe70   :  { %v2159_v57 = vpop.xlane.xlu1 %2158 }
 0xe71   :  { %5162 = vpow2.f32 %v1992_v46  ;;  %v2164_v58 = vmul.f32 0.03125, %v2159_v57 }
 0xe73   :  { %v2166_v61 = vsub.f32 %v2155_v42, %v2164_v58 }
 0xe75   :  { %v2168_v1 = vmul.f32 %v2166_v61, %v2166_v61 }
 0xe77   :  { %v2170_v3 = vsel %vm148_vm0, %v2168_v1, 0.0 }
 0xe7e   :  { %v5163_v47 = vpop.eup %5162 }
 0xe7f   :  { %v1994_v48 = vsel %vm237_vm2, %v5163_v47, 0.0 }
 0xe80   :  { %1995 = vadd.xlane.f32.xlu0 %v1994_v48 }
 0xe96   :  { %1999 = vrot.lane.b32.xlu0 %v5528_v9, %s5402_s7 }
 0xe9a   :  { %2296 = vrot.lane.b32.xlu0 %v2198_v7, %s5393_s28 }
 0xe9c   :  { %v1904_v49 = vpop.f32.mrf.mxu0 }
 0xe9d   :  { %v1908_v50 = vadd.f32 %v1904_v49, %v1666_v14 }
 0xe9e   :  { %v4923_v51 = vpop.f32.mrf.mxu0 }
 0xf09   :  { %v1996_v52 = vpop.xlane.xlu0 %1995 }
 0xf0a   :  { %5164 = vrcp.f32 %v1996_v52 }
 0xf0d   :  { %v2000_v2 = vpop.permute.xlu0 %1999 }
 0xf0e   :  { %4930 = vmatpush3.msra.mxu0 %v2000_v2 }
 0xf0f   :  { %4939 = vmatprep.subr.mxu0 %v2199_v4 }
 0xf11   :  { %v2297_v27 = vpop.permute.xlu0 %2296 }
 0xf17   :  { %v5165_v53 = vpop.eup %5164 }
 0xf18   :  { %v1998_v54 = vmul.f32 %v5165_v53, %v5163_v47 }
 0xf1a   :  { %4932 = vmatmul.mubr.msk.f32.vlgmr.msra.gmra.mxu0 %vm237_vm2, %v1998_v54 }
 0xf1b   :  { %4940 = vmatpush3.msra.mxu0 %v2199_v4 }
 0xf1c   :  { %4941 = vmatprep.subr.mxu0 %v2198_v7 }
 0xf1d   :  { %4942 = vmatpush3.msra.mxu0 %v2198_v7 }
 0xfda   :  { %v2071_v55 = vpop.f32.mrf.mxu0 }
 0xfdb   :  { %4937 = vmatmul.mubr.msk.f32.vlgmr.msra.gmra.mxu1 %vm237_vm2, %v2071_v55 }
 0xfdc   :  { %v4933_v56 = vpop.f32.mrf.mxu0  ;;  %4958 = vmatprep.mubr.msk.f32.mxu1 %vm148_vm0, %v133_v25 }
0x109b   :  { %v2144_v59 = vpop.f32.mrf.mxu1 }
0x109c   :  { %v2148_v60 = vadd.f32 %v2144_v59, %v1908_v50 }
0x109d   :  { %v4938_v9 = vpop.f32.mrf.mxu1 }
0x109e   :  { %v2154_v62 = vadd.f32 %v2152_v34, %v2148_v60 }
0x10a0   :  { %v2156_v63 = vadd.f32 %v2154_v62, %v5518_v5  ;;  %v2197_v5 = vld [vmem:[%s6045_s5 + $0x8] sm:$0xff] }
0x10a1   :  { %2294 = vrot.lane.b32.xlu0 %v2197_v5, %s5393_s28  ;;  %4943 = vmatprep.subr.mxu0 %v2197_v5 }
0x10a2   :  { %v2160_v0 = vsel %vm148_vm0, %v2156_v63, 0.0  ;;  %4944 = vmatpush3.msra.mxu0 %v2197_v5 }
0x10a3   :  { %2161 = vadd.xlane.f32.xlu1 %v2160_v0  ;;  %4945 = vmatprep.subr.mxu0 %v2196_v41 }
0x10a4   :  { %4946 = vmatpush3.msra.mxu0 %v2196_v41 }
0x10a5   :  { %2292 = vrot.lane.b32.xlu0 %v2196_v41, %s5393_s28  ;;  %4961 = vmatprep.subr.mxu0 %v5390_v6 }
0x10a7   :  { %2171 = vadd.xlane.f32.xlu1 %v2170_v3 }
0x10a9   :  { %2304 = vrot.lane.b32.xlu0 %v5767_v26, %s5393_s28 }
0x1113   :  { %v2295_v32 = vpop.permute.xlu0 %2294 }
0x1117   :  { %v2293_v36 = vpop.permute.xlu0 %2292 }
0x111b   :  { %v5783_v43 = vpop.permute.xlu0 %2304 }
0x112c   :  { %v2162_v10 = vpop.xlane.xlu1 %2161 }
0x112d   :  { %v2165_v12 = vmul.f32 0.03125, %v2162_v10  ;;  %v5825_v10 = vld [vmem:[#allocation10 + $0x8] sm:$0xff] }
0x112f   :  { %v2167_v13 = vsub.f32 %v2156_v63, %v2165_v12 }
0x1130   :  { %v2172_v14 = vpop.xlane.xlu1 %2171 }
0x1131   :  { %v2176_v15 = vmul.f32 0.03125, %v2172_v14  ;;  %v2169_v16 = vmul.f32 %v2167_v13, %v2167_v13 }
0x1133   :  { %v2178_v17 = vadd.f32 1e-05, %v2176_v15  ;;  %v2173_v18 = vsel %vm148_vm0, %v2169_v16, 0.0  ;;  %v5830_v16 = vld [vmem:[#allocation10] sm:$0xff] }
0x1134   :  { %2174 = vadd.xlane.f32.xlu1 %v2173_v18 }
0x1135   :  { %5166 = vrsqrt.f32 %v2178_v17 }
0x1142   :  { %v5167_v21 = vpop.eup %5166 }
0x1143   :  { %v2182_v22 = vmul.f32 %v5167_v21, %v2166_v61 }
0x1145   :  { %v2188_v11 = vmul.f32 %v2187_v20, %v2182_v22  ;;  %2298 = vrot.lane.b32.xlu1 %v2199_v4, %s5393_s28 }
0x1147   :  { %v5762_v24 = vadd.f32 %v2193_v23, %v2188_v11 }
0x1149   :  { %4947 = vmatprep.mubr.msk.f32.mxu0 %vm148_vm0, %v5762_v24 }
0x11bd   :  { %v2175_v28 = vpop.xlane.xlu1 %2174 }
0x11be   :  { %v2177_v29 = vmul.f32 0.03125, %v2175_v28 }
0x11c0   :  { %v2179_v34 = vadd.f32 1e-05, %v2177_v29 }
0x11c1   :  { %v2299_v35 = vpop.permute.xlu1 %2298 }
0x11c2   :  { %5168 = vrsqrt.f32 %v2179_v34  ;;  %4950 = vmatprep.subr.mxu1 %v2299_v35 }
0x11c3   :  { %4951 = vmatpush3.msra.mxu1 %v2299_v35 }
0x11c4   :  { %4952 = vmatprep.subr.mxu1 %v2297_v27 }
0x11c5   :  { %4953 = vmatpush3.msra.mxu1 %v2297_v27 }
0x11c6   :  { %4954 = vmatprep.subr.mxu1 %v2295_v32 }
0x11c7   :  { %4955 = vmatpush3.msra.mxu1 %v2295_v32 }
0x11c8   :  { %4956 = vmatprep.subr.mxu1 %v2293_v36 }
0x11c9   :  { %4957 = vmatpush3.msra.mxu1 %v2293_v36 }
0x11ca   :  { %4959 = vmatmul.mubr.msk.f32.vlgmr.msra.gmra.mxu1 %vm148_vm0, %v134_v31  ;;  %4966 = vmatprep.subr.mxu1 %v5390_v6 }
0x11cb   :  { %4968 = vmatprep.mubr.msk.f32.mxu1 %vm5391_vm1, %v5390_v6 }
0x11cf   :  { %v5169_v37 = vpop.eup %5168 }
0x11d0   :  { %v2183_v38 = vmul.f32 %v5169_v37, %v2167_v13 }
0x11d2   :  { %v2189_v39 = vmul.f32 %v2187_v20, %v2183_v38 }
0x11d4   :  { %v5775_v40 = vadd.f32 %v2193_v23, %v2189_v39 }
0x11d6   :  { %4948 = vmatmul.mubr.msk.f32.vlgmr.msra.gmra.mxu0 %vm148_vm0, %v5775_v40 }
0x11d7   :  { %4963 = vmatprep.mubr.msk.f32.mxu0 %vm5391_vm1, %v5390_v6 }
0x128a   :  { %v5781_v42 = vpop.f32.mrf.mxu1 }
0x128c   :  { %v2379_v44 = vpop.f32.mrf.mxu1 }
0x128d   :  { %v5786_v45 = vadd.f32 %v2379_v44, %v5783_v43 }
0x128f   :  { %2558 = vrot.lane.b32.xlu1 %v5786_v45, %s5392_s2  ;;  %4962 = vmatpush3.xpose.msk.msra.mxu0 %vm237_vm2, %v5786_v45 }
0x1290   :  { %4971 = vmatprep.subr.mxu0 %v5390_v6 }
0x1296   :  { %v5793_v46 = vpop.f32.mrf.mxu0 }
0x1298   :  { %v2279_v47 = vpop.f32.mrf.mxu0 }
0x1299   :  { %v5796_v48 = vadd.f32 %v5767_v26, %v2279_v47 }
0x129b   :  { %2556 = vrot.lane.b32.xlu0 %v5796_v48, %s5392_s2  ;;  %4964 = vmatmul.mubr.msk.f32.vlgmr.msra.gmra.mxu0 %vm237_vm2, %v5796_v48 }
0x129c   :  { %4973 = vmatprep.mubr.msk.f32.mxu0 %vm5391_vm1, %v5390_v6 }
0x1301   :  { %v2559_v49 = vpop.permute.xlu1 %2558 }
0x1302   :  { %4972 = vmatpush3.xpose.msk.msra.mxu0 %vm237_vm2, %v2559_v49 }
0x1303   :  { %4981 = vmatprep.subr.mxu0 %v5390_v6 }
0x130d   :  { %v2557_v50 = vpop.permute.xlu0 %2556 }
0x130e   :  { %4974 = vmatmul.mubr.msk.f32.vlgmr.msra.gmra.mxu0 %vm237_vm2, %v2557_v50  ;;  %v5865_v50 = vld [vmem:[#allocation10 + $0x10] sm:$0xff] }
0x130f   :  { %4983 = vmatprep.mubr.msk.f32.mxu0 %vm5391_vm1, %v5390_v6  ;;  %4982 = vmatpush3.msra.mxu0 %v5825_v10 }
0x1310   :  { %4991 = vmatprep.subr.mxu0 %v5390_v6 }
0x135b   :  { %v2464_v51 = vpop.f32.mrf.mxu0 }
0x135c   :  { %v2468_v52 = vmul.f32 0.35355338, %v2464_v51 }
0x135d   :  { %v4965_v2 = vpop.f32.mrf.mxu0 }
0x135e   :  { %v2469_v53 = vsel %vm237_vm2, %v2468_v52, -inf }
0x135f   :  { %2470 = vmax.xlane.f32.xlu1 %v2469_v53 }
0x13ce   :  { %v2630_v54 = vpop.f32.mrf.mxu0 }
0x13cf   :  { %v2634_v55 = vmul.f32 0.35355338, %v2630_v54 }
0x13d0   :  { %v4975_v56 = vpop.f32.mrf.mxu0 }
0x13d1   :  { %v2635_v57 = vsel %vm237_vm2, %v2634_v55, -inf  ;;  %v5877_v56 = vadd.f32 %v5793_v46, %v5767_v26 }
0x13d2   :  { %2636 = vmax.xlane.f32.xlu0 %v2635_v57 }
0x13e8   :  { %v2471_v58 = vpop.xlane.xlu1 %2470 }
0x13e9   :  { %v2472_v59 = vsub.f32 %v2468_v52, %v2471_v58 }
0x13eb   :  { %v2473_v60 = vmul.f32 1.442695, %v2472_v59 }
0x13ed   :  { %5170 = vpow2.f32 %v2473_v60 }
0x13fa   :  { %v5171_v9 = vpop.eup %5170 }
0x13fb   :  { %v2475_v61 = vsel %vm237_vm2, %v5171_v9, 0.0 }
0x13fc   :  { %2476 = vadd.xlane.f32.xlu0 %v2475_v61 }
0x1412   :  { %2480 = vrot.lane.b32.xlu0 %v5786_v45, %s5393_s28 }
0x1416   :  { %2868 = vrot.lane.b32.xlu0 %v5796_v48, %s5398_s14 }
0x145b   :  { %v2637_v62 = vpop.xlane.xlu0 %2636 }
0x145c   :  { %v2638_v63 = vsub.f32 %v2634_v55, %v2637_v62 }
0x145e   :  { %v2639_v0 = vmul.f32 1.442695, %v2638_v63 }
0x1460   :  { %5172 = vpow2.f32 %v2639_v0 }
0x146d   :  { %v5173_v1 = vpop.eup %5172 }
0x146e   :  { %v2641_v3 = vsel %vm237_vm2, %v5173_v1, 0.0 }
0x146f   :  { %2642 = vadd.xlane.f32.xlu1 %v2641_v3 }
0x1480   :  { %2646 = vrot.lane.b32.xlu1 %v5786_v45, %s5394_s29 }
0x1484   :  { %2870 = vrot.lane.b32.xlu1 %v5786_v45, %s5398_s14 }
0x1485   :  { %v2477_v4 = vpop.xlane.xlu0 %2476 }
0x1486   :  { %5174 = vrcp.f32 %v2477_v4  ;;  %v5906_v4 = vld [vmem:[#allocation10 + $0x18] sm:$0xff] }
0x1489   :  { %v2481_v7 = vpop.permute.xlu0 %2480 }
0x148a   :  { %4967 = vmatpush3.msra.mxu1 %v2481_v7 }
0x148b   :  { %4976 = vmatprep.subr.mxu1 %v5390_v6 }
0x148d   :  { %v2869_v21 = vpop.permute.xlu0 %2868 }
0x1493   :  { %v5175_v5 = vpop.eup %5174 }
0x1494   :  { %v2479_v41 = vmul.f32 %v5175_v5, %v5171_v9 }
0x1496   :  { %4969 = vmatmul.mubr.msk.f32.vlgmr.msra.gmra.mxu1 %vm237_vm2, %v2479_v41 }
0x1497   :  { %4978 = vmatprep.mubr.msk.f32.mxu1 %vm5391_vm1, %v5390_v6 }
0x14f8   :  { %v2643_v12 = vpop.xlane.xlu1 %2642 }
0x14f9   :  { %5176 = vrcp.f32 %v2643_v12 }
0x14fc   :  { %v2647_v13 = vpop.permute.xlu1 %2646 }
0x14fd   :  { %4977 = vmatpush3.msra.mxu1 %v2647_v13 }
0x14fe   :  { %4986 = vmatprep.subr.mxu1 %v5390_v6 }
0x1500   :  { %v2871_v8 = vpop.permute.xlu1 %2870 }
0x1506   :  { %v5177_v14 = vpop.eup %5176 }
0x1507   :  { %v2645_v15 = vmul.f32 %v5177_v14, %v5173_v1 }
0x1509   :  { %4979 = vmatmul.mubr.msk.f32.vlgmr.msra.gmra.mxu1 %vm237_vm2, %v2645_v15 }
0x150a   :  { %4987 = vmatpush3.msra.mxu1 %v5830_v16  ;;  %4988 = vmatprep.mubr.msk.f32.mxu1 %vm5391_vm1, %v5390_v6 }
0x150b   :  { %4996 = vmatprep.subr.mxu1 %v5390_v6 }
0x1556   :  { %v2552_v17 = vpop.f32.mrf.mxu1 }
0x1557   :  { %4989 = vmatmul.mubr.msk.f32.vlgmr.msra.gmra.mxu1 %vm237_vm2, %v2552_v17 }
0x1558   :  { %v4970_v18 = vpop.f32.mrf.mxu1  ;;  %4998 = vmatprep.mubr.msk.f32.mxu1 %vm5391_vm1, %v5390_v6 }
0x15c9   :  { %v2718_v19 = vpop.f32.mrf.mxu1 }
0x15ca   :  { %4984 = vmatmul.mubr.msk.f32.vlgmr.msra.gmra.mxu0 %vm237_vm2, %v2718_v19 }
0x15cb   :  { %4992 = vmatpush3.xpose.msk.msra.mxu0 %vm237_vm2, %v2871_v8  ;;  %v4980_v20 = vpop.f32.mrf.mxu1  ;;  %4993 = vmatprep.mubr.msk.f32.mxu0 %vm5391_vm1, %v5390_v6 }
0x15cc   :  { %5001 = vmatprep.subr.mxu0 %v5390_v6 }
0x15ce   :  { %4994 = vmatmul.mubr.msk.f32.vlgmr.msra.gmra.mxu0 %vm237_vm2, %v2869_v21 }
0x15cf   :  { %5003 = vmatprep.mubr.msk.f32.mxu0 %vm5391_vm1, %v5390_v6  ;;  %5002 = vmatpush3.msra.mxu0 %v5865_v50 }
0x15d0   :  { %5011 = vmatprep.subr.mxu0 %v5390_v6 }
0x1617   :  { %v2864_v22 = vpop.f32.mrf.mxu1 }
0x1619   :  { %v4990_v23 = vpop.f32.mrf.mxu1 }
0x168a   :  { %v2791_v11 = vpop.f32.mrf.mxu0 }
0x168b   :  { %v2865_v26 = vadd.f32 %v2864_v22, %v2791_v11 }
0x168c   :  { %v4985_v25 = vpop.f32.mrf.mxu0 }
0x168e   :  { %v2942_v27 = vpop.f32.mrf.mxu0 }
0x168f   :  { %v2946_v28 = vmul.f32 0.35355338, %v2942_v27 }
0x1690   :  { %v4995_v29 = vpop.f32.mrf.mxu0 }
0x1691   :  { %v2947_v32 = vsel %vm237_vm2, %v2946_v28, -inf }
0x1692   :  { %2948 = vmax.xlane.f32.xlu1 %v2947_v32 }
0x16a3   :  { %3110 = vrot.lane.b32.xlu1 %v5786_v45, %s5400_s19 }
0x16a7   :  { %3108 = vrot.lane.b32.xlu1 %v5796_v48, %s5400_s19 }
0x171b   :  { %v2949_v34 = vpop.xlane.xlu1 %2948 }
0x171c   :  { %v2950_v35 = vsub.f32 %v2946_v28, %v2949_v34 }
0x171e   :  { %v2951_v36 = vmul.f32 1.442695, %v2950_v35 }
0x171f   :  { %v3111_v47 = vpop.permute.xlu1 %3110 }
0x1720   :  { %5178 = vpow2.f32 %v2951_v36 }
0x1723   :  { %v3109_v49 = vpop.permute.xlu1 %3108 }
0x172d   :  { %v5179_v31 = vpop.eup %5178 }
0x172e   :  { %v2953_v37 = vsel %vm237_vm2, %v5179_v31, 0.0 }
0x172f   :  { %2954 = vadd.xlane.f32.xlu0 %v2953_v37 }
0x1745   :  { %2958 = vrot.lane.b32.xlu0 %v5786_v45, %s5397_s13 }
0x17b8   :  { %v2955_v38 = vpop.xlane.xlu0 %2954 }
0x17b9   :  { %5180 = vrcp.f32 %v2955_v38 }
0x17bc   :  { %v2959_v39 = vpop.permute.xlu0 %2958 }
0x17bd   :  { %4997 = vmatpush3.msra.mxu1 %v2959_v39 }
0x17be   :  { %5006 = vmatprep.subr.mxu1 %v5390_v6 }
0x17c6   :  { %v5181_v44 = vpop.eup %5180 }
0x17c7   :  { %v2957_v48 = vmul.f32 %v5181_v44, %v5179_v31 }
0x17c9   :  { %4999 = vmatmul.mubr.msk.f32.vlgmr.msra.gmra.mxu1 %vm237_vm2, %v2957_v48 }
0x17ca   :  { %5007 = vmatpush3.xpose.msk.msra.mxu1 %vm237_vm2, %v3111_v47  ;;  %5008 = vmatprep.mubr.msk.f32.mxu1 %vm5391_vm1, %v5390_v6 }
0x17cb   :  { %5016 = vmatprep.subr.mxu1 %v5390_v6 }
0x17cd   :  { %5009 = vmatmul.mubr.msk.f32.vlgmr.msra.gmra.mxu1 %vm237_vm2, %v3109_v49 }
0x17ce   :  { %5018 = vmatprep.mubr.msk.f32.mxu1 %vm5391_vm1, %v5390_v6  ;;  %5017 = vmatpush3.msra.mxu1 %v5906_v4 }
0x17cf   :  { %5026 = vmatprep.subr.mxu1 %v5390_v6 }
0x1889   :  { %v3030_v51 = vpop.f32.mrf.mxu1 }
0x188a   :  { %5004 = vmatmul.mubr.msk.f32.vlgmr.msra.gmra.mxu0 %vm237_vm2, %v3030_v51 }
0x188b   :  { %v5000_v52 = vpop.f32.mrf.mxu1  ;;  %5013 = vmatprep.mubr.msk.f32.mxu0 %vm5391_vm1, %v5390_v6 }
0x188d   :  { %v3182_v2 = vpop.f32.mrf.mxu1 }
0x188e   :  { %v3186_v53 = vmul.f32 0.35355338, %v3182_v2 }
0x188f   :  { %v5010_v54 = vpop.f32.mrf.mxu1 }
0x1890   :  { %v3187_v55 = vsel %vm237_vm2, %v3186_v53, -inf }
0x1891   :  { %3188 = vmax.xlane.f32.xlu0 %v3187_v55 }
0x18a7   :  { %3198 = vrot.lane.b32.xlu0 %v5786_v45, %s5399_s18  ;;  %v5885_v45 = vadd.f32 %v5781_v42, %v5783_v43 }
0x18ab   :  { %3512 = vrot.lane.b32.xlu0 %v5877_v56, %s5392_s2 }
0x191a   :  { %v3189_v57 = vpop.xlane.xlu0 %3188 }
0x191b   :  { %v3190_v58 = vsub.f32 %v3186_v53, %v3189_v57 }
0x191d   :  { %v3191_v59 = vmul.f32 1.442695, %v3190_v58 }
0x191e   :  { %v3199_v60 = vpop.permute.xlu0 %3198 }
0x191f   :  { %5182 = vpow2.f32 %v3191_v59  ;;  %5012 = vmatpush3.msra.mxu0 %v3199_v60 }
0x1920   :  { %5021 = vmatprep.subr.mxu0 %v5390_v6 }
0x1922   :  { %v3513_v43 = vpop.permute.xlu0 %3512 }
0x192c   :  { %v5183_v9 = vpop.eup %5182 }
0x192d   :  { %v3193_v61 = vsel %vm237_vm2, %v5183_v9, 0.0 }
0x192e   :  { %3194 = vadd.xlane.f32.xlu1 %v3193_v61 }
0x193f   :  { %3514 = vrot.lane.b32.xlu1 %v5885_v45, %s5392_s2 }
0x194a   :  { %v3103_v46 = vpop.f32.mrf.mxu0 }
0x194b   :  { %v3107_v62 = vadd.f32 %v3103_v46, %v2865_v26 }
0x194c   :  { %v5005_v63 = vpop.f32.mrf.mxu0 }
0x19b7   :  { %v3195_v0 = vpop.xlane.xlu1 %3194 }
0x19b8   :  { %5184 = vrcp.f32 %v3195_v0 }
0x19bb   :  { %v3515_v42 = vpop.permute.xlu1 %3514 }
0x19c5   :  { %v5185_v1 = vpop.eup %5184 }
0x19c6   :  { %v3197_v3 = vmul.f32 %v5185_v1, %v5183_v9 }
0x19c8   :  { %5014 = vmatmul.mubr.msk.f32.vlgmr.msra.gmra.mxu0 %vm237_vm2, %v3197_v3 }
0x19c9   :  { %5022 = vmatpush3.xpose.msk.msra.mxu0 %vm237_vm2, %v5885_v45  ;;  %5023 = vmatprep.mubr.msk.f32.mxu0 %vm5391_vm1, %v5390_v6 }
0x19ca   :  { %5031 = vmatprep.subr.mxu0 %v5390_v6 }
0x19cc   :  { %5024 = vmatmul.mubr.msk.f32.vlgmr.msra.gmra.mxu0 %vm237_vm2, %v5877_v56 }
0x19cd   :  { %5032 = vmatpush3.xpose.msk.msra.mxu0 %vm237_vm2, %v3515_v42  ;;  %5033 = vmatprep.mubr.msk.f32.mxu0 %vm5391_vm1, %v5390_v6 }
0x19ce   :  { %5041 = vmatprep.subr.mxu0 %v5390_v6 }
0x19d0   :  { %5034 = vmatmul.mubr.msk.f32.vlgmr.msra.gmra.mxu0 %vm237_vm2, %v3513_v43 }
0x19d1   :  { %5042 = vmatpush3.msra.mxu0 %v5825_v10  ;;  %5043 = vmatprep.mubr.msk.f32.mxu0 %vm5391_vm1, %v5390_v6 }
0x19d2   :  { %5051 = vmatprep.subr.mxu0 %v5390_v6 }
0x1a88   :  { %v3270_v7 = vpop.f32.mrf.mxu0 }
0x1a89   :  { %5019 = vmatmul.mubr.msk.f32.vlgmr.msra.gmra.mxu1 %vm237_vm2, %v3270_v7 }
0x1a8a   :  { %v5015_v5 = vpop.f32.mrf.mxu0  ;;  %5028 = vmatprep.mubr.msk.f32.mxu1 %vm5391_vm1, %v5390_v6 }
0x1a8c   :  { %v3420_v41 = vpop.f32.mrf.mxu0 }
0x1a8d   :  { %v3424_v10 = vmul.f32 0.35355338, %v3420_v41 }
0x1a8e   :  { %v5025_v12 = vpop.f32.mrf.mxu0 }
0x1a8f   :  { %v3425_v13 = vsel %vm237_vm2, %v3424_v10, -inf }
0x1a90   :  { %3426 = vmax.xlane.f32.xlu1 %v3425_v13  ;;  %v3586_v14 = vpop.f32.mrf.mxu0 }
0x1a91   :  { %v3590_v15 = vmul.f32 0.35355338, %v3586_v14 }
0x1a92   :  { %v5035_v17 = vpop.f32.mrf.mxu0 }
0x1a93   :  { %v3591_v18 = vsel %vm237_vm2, %v3590_v15, -inf }
0x1a94   :  { %3592 = vmax.xlane.f32.xlu0 %v3591_v18  ;;  %v4306_v18 = vsub.s32 1, %v5716_v30 }
0x1b19   :  { %v3427_v19 = vpop.xlane.xlu1 %3426 }
0x1b1a   :  { %v3428_v8 = vsub.f32 %v3424_v10, %v3427_v19  ;;  %v4307_v19 = vrot.slane %v5722_v33, %v4306_v18 }
0x1b1c   :  { %v3429_v20 = vmul.f32 1.442695, %v3428_v8 }
0x1b1d   :  { %v3593_v21 = vpop.xlane.xlu0 %3592 }
0x1b1e   :  { %5186 = vpow2.f32 %v3429_v20  ;;  %v3594_v22 = vsub.f32 %v3590_v15, %v3593_v21 }
0x1b20   :  { %v3595_v23 = vmul.f32 1.442695, %v3594_v22 }
0x1b22   :  { %5188 = vpow2.f32 %v3595_v23 }
0x1b2b   :  { %v5187_v11 = vpop.eup %5186 }
0x1b2c   :  { %v3431_v25 = vsel %vm237_vm2, %v5187_v11, 0.0 }
0x1b2d   :  { %3432 = vadd.xlane.f32.xlu0 %v3431_v25 }
0x1b2f   :  { %v5189_v27 = vpop.eup %5188 }
0x1b30   :  { %v3597_v28 = vsel %vm237_vm2, %v5189_v27, 0.0 }
0x1b31   :  { %3598 = vadd.xlane.f32.xlu1 %v3597_v28 }
0x1b42   :  { %3602 = vrot.lane.b32.xlu1 %v5885_v45, %s5394_s29 }
0x1b43   :  { %3436 = vrot.lane.b32.xlu0 %v5885_v45, %s5393_s28 }
0x1b46   :  { %3826 = vrot.lane.b32.xlu1 %v5885_v45, %s5398_s14 }
0x1b47   :  { %3824 = vrot.lane.b32.xlu0 %v5877_v56, %s5398_s14 }
0x1b49   :  { %v3343_v29 = vpop.f32.mrf.mxu1 }
0x1b4a   :  { %v5925_v32 = vadd.f32 %v3343_v29, %v3107_v62 }
0x1b4b   :  { %v5020_v34 = vpop.f32.mrf.mxu1 }
0x1bb6   :  { %v3433_v35 = vpop.xlane.xlu0 %3432 }
0x1bb7   :  { %5190 = vrcp.f32 %v3433_v35 }
0x1bba   :  { %v3599_v36 = vpop.xlane.xlu1 %3598  ;;  %v3437_v31 = vpop.permute.xlu0 %3436 }
0x1bbb   :  { %5192 = vrcp.f32 %v3599_v36  ;;  %5027 = vmatpush3.msra.mxu1 %v3437_v31 }
0x1bbc   :  { %5036 = vmatprep.subr.mxu1 %v5390_v6 }
0x1bbe   :  { %v3603_v39 = vpop.permute.xlu1 %3602 }
0x1bc2   :  { %v3827_v52 = vpop.permute.xlu1 %3826 }
0x1bc4   :  { %v5191_v37 = vpop.eup %5190 }
0x1bc5   :  { %v3435_v38 = vmul.f32 %v5191_v37, %v5187_v11 }
0x1bc7   :  { %5029 = vmatmul.mubr.msk.f32.vlgmr.msra.gmra.mxu1 %vm237_vm2, %v3435_v38 }
0x1bc8   :  { %v5193_v44 = vpop.eup %5192  ;;  %5037 = vmatpush3.msra.mxu1 %v3603_v39  ;;  %5038 = vmatprep.mubr.msk.f32.mxu1 %vm5391_vm1, %v5390_v6 }
0x1bc9   :  { %v3601_v47 = vmul.f32 %v5193_v44, %v5189_v27  ;;  %5046 = vmatprep.subr.mxu1 %v5390_v6 }
0x1bcb   :  { %5039 = vmatmul.mubr.msk.f32.vlgmr.msra.gmra.mxu1 %vm237_vm2, %v3601_v47 }
0x1bcc   :  { %5047 = vmatpush3.msra.mxu1 %v5830_v16  ;;  %5048 = vmatprep.mubr.msk.f32.mxu1 %vm5391_vm1, %v5390_v6  ;;  %v3825_v16 = vpop.permute.xlu0 %3824 }
0x1bcd   :  { %5056 = vmatprep.subr.mxu1 %v5390_v6 }
0x1c87   :  { %v3508_v48 = vpop.f32.mrf.mxu1 }
0x1c88   :  { %5049 = vmatmul.mubr.msk.f32.vlgmr.msra.gmra.mxu1 %vm237_vm2, %v3508_v48 }
0x1c89   :  { %v5030_v49 = vpop.f32.mrf.mxu1  ;;  %5058 = vmatprep.mubr.msk.f32.mxu1 %vm5391_vm1, %v5390_v6 }
0x1c8b   :  { %v3674_v51 = vpop.f32.mrf.mxu1 }
0x1c8c   :  { %5044 = vmatmul.mubr.msk.f32.vlgmr.msra.gmra.mxu0 %vm237_vm2, %v3674_v51 }
0x1c8d   :  { %5052 = vmatpush3.xpose.msk.msra.mxu0 %vm237_vm2, %v3827_v52  ;;  %v5040_v2 = vpop.f32.mrf.mxu1  ;;  %5053 = vmatprep.mubr.msk.f32.mxu0 %vm5391_vm1, %v5390_v6 }
0x1c8e   :  { %5061 = vmatprep.subr.mxu0 %v5390_v6 }
0x1c90   :  { %5054 = vmatmul.mubr.msk.f32.vlgmr.msra.gmra.mxu0 %vm237_vm2, %v3825_v16 }
0x1c91   :  { %5062 = vmatpush3.msra.mxu0 %v5865_v50  ;;  %5063 = vmatprep.mubr.msk.f32.mxu0 %vm5391_vm1, %v5390_v6 }
0x1c92   :  { %5071 = vmatprep.subr.mxu0 %v5390_v6 }
0x1d48   :  { %v3820_v53 = vpop.f32.mrf.mxu1 }
0x1d4a   :  { %v5050_v54 = vpop.f32.mrf.mxu1 }
0x1d4c   :  { %v3747_v55 = vpop.f32.mrf.mxu0 }
0x1d4d   :  { %v3821_v57 = vadd.f32 %v3820_v53, %v3747_v55 }
0x1d4e   :  { %v5045_v58 = vpop.f32.mrf.mxu0 }
0x1d50   :  { %v3898_v59 = vpop.f32.mrf.mxu0 }
0x1d51   :  { %v3902_v60 = vmul.f32 0.35355338, %v3898_v59 }
0x1d52   :  { %v5055_v9 = vpop.f32.mrf.mxu0 }
0x1d53   :  { %v3903_v61 = vsel %vm237_vm2, %v3902_v60, -inf }
0x1d54   :  { %3904 = vmax.xlane.f32.xlu1 %v3903_v61 }
0x1d65   :  { %4066 = vrot.lane.b32.xlu1 %v5885_v45, %s5400_s19 }
0x1d69   :  { %4064 = vrot.lane.b32.xlu1 %v5877_v56, %s5400_s19 }
0x1ddd   :  { %v3905_v50 = vpop.xlane.xlu1 %3904 }
0x1dde   :  { %v3906_v26 = vsub.f32 %v3902_v60, %v3905_v50 }
0x1de0   :  { %v3907_v46 = vmul.f32 1.442695, %v3906_v26  ;;  %v4353_v26 = vld [vmem:[#allocation11 + $0x18] sm:$0xff] }
0x1de1   :  { %v4067_v42 = vpop.permute.xlu1 %4066 }
0x1de2   :  { %5194 = vpow2.f32 %v3907_v46  ;;  %v4352_v46 = vld [vmem:[#allocation11 + $0x10] sm:$0xff] }
0x1de5   :  { %v4065_v43 = vpop.permute.xlu1 %4064 }
0x1def   :  { %v5195_v62 = vpop.eup %5194 }
0x1df0   :  { %v3909_v63 = vsel %vm237_vm2, %v5195_v62, 0.0 }
0x1df1   :  { %3910 = vadd.xlane.f32.xlu0 %v3909_v63  ;;  %v4350_v63 = vld [vmem:[#allocation11] sm:$0xff] }
0x1e07   :  { %3914 = vrot.lane.b32.xlu0 %v5885_v45, %s5397_s13 }
0x1e7a   :  { %v3911_v0 = vpop.xlane.xlu0 %3910 }
0x1e7b   :  { %5196 = vrcp.f32 %v3911_v0  ;;  %v4450_v0 = vld [vmem:[%s6050_s10 + $0x30] sm:$0xff] }
0x1e7e   :  { %v3915_v1 = vpop.permute.xlu0 %3914 }
0x1e7f   :  { %5057 = vmatpush3.msra.mxu1 %v3915_v1  ;;  %v4449_v1 = vld [vmem:[%s6050_s10 + $0x28] sm:$0xff] }
0x1e80   :  { %5066 = vmatprep.subr.mxu1 %v5390_v6 }
0x1e88   :  { %v5197_v3 = vpop.eup %5196 }
0x1e89   :  { %v3913_v56 = vmul.f32 %v5197_v3, %v5195_v62  ;;  %v4351_v62 = vld [vmem:[#allocation11 + $0x8] sm:$0xff]  ;;  %v4448_v3 = vld [vmem:[%s6050_s10 + $0x20] sm:$0xff] }
0x1e8b   :  { %5059 = vmatmul.mubr.msk.f32.vlgmr.msra.gmra.mxu1 %vm237_vm2, %v3913_v56 }
0x1e8c   :  { %5067 = vmatpush3.xpose.msk.msra.mxu1 %vm237_vm2, %v4067_v42  ;;  %5068 = vmatprep.mubr.msk.f32.mxu1 %vm5391_vm1, %v5390_v6 }
0x1e8d   :  { %5076 = vmatprep.subr.mxu1 %v5390_v6 }
0x1e8f   :  { %5069 = vmatmul.mubr.msk.f32.vlgmr.msra.gmra.mxu1 %vm237_vm2, %v4065_v43 }
0x1e90   :  { %5077 = vmatpush3.msra.mxu1 %v5906_v4  ;;  %5078 = vmatprep.mubr.msk.f32.mxu1 %vm5391_vm1, %v5390_v6 }
0x1f4b   :  { %v3986_v7 = vpop.f32.mrf.mxu1 }
0x1f4c   :  { %5064 = vmatmul.mubr.msk.f32.vlgmr.msra.gmra.mxu0 %vm237_vm2, %v3986_v7 }
0x1f4d   :  { %v5060_v5 = vpop.f32.mrf.mxu1  ;;  %5073 = vmatprep.mubr.msk.f32.mxu0 %vm5391_vm1, %v5390_v6  ;;  %v4308_v6 = vadd.f32 %v4307_v19, %v5925_v32 }
0x1f4f   :  { %v4138_v41 = vpop.f32.mrf.mxu1  ;;  %v4310_v21 = vadd.f32 %v4308_v6, %v5762_v24 }
0x1f50   :  { %v4142_v10 = vmul.f32 0.35355338, %v4138_v41 }
0x1f51   :  { %v5070_v12 = vpop.f32.mrf.mxu1 }
0x1f52   :  { %v4143_v13 = vsel %vm237_vm2, %v4142_v10, -inf  ;;  %v4447_v12 = vld [vmem:[%s6050_s10 + $0x18] sm:$0xff] }
0x1f53   :  { %4144 = vmax.xlane.f32.xlu0 %v4143_v13  ;;  %v4446_v13 = vld [vmem:[%s6050_s10 + $0x10] sm:$0xff] }
0x1f69   :  { %4154 = vrot.lane.b32.xlu0 %v5885_v45, %s5399_s18  ;;  %v4312_v45 = vsel %vm148_vm0, %v4310_v21, 0.0 }
0x1fdc   :  { %v4145_v4 = vpop.xlane.xlu0 %4144 }
0x1fdd   :  { %v4146_v14 = vsub.f32 %v4142_v10, %v4145_v4  ;;  %v4445_v4 = vld [vmem:[%s6050_s10 + $0x8] sm:$0xff] }
0x1fdf   :  { %v4147_v15 = vmul.f32 1.442695, %v4146_v14  ;;  %v4444_v14 = vld [vmem:[%s6050_s10] sm:$0xff] }
0x1fe0   :  { %v4155_v17 = vpop.permute.xlu0 %4154 }
0x1fe1   :  { %5198 = vpow2.f32 %v4147_v15  ;;  %5072 = vmatpush3.msra.mxu0 %v4155_v17  ;;  %v4672_v15 = vld [vmem:[#allocation13] ss:$0 sm:$0xff] }
0x1fe2   :  { %5081 = vmatprep.subr.mxu0 %v4353_v26 }
0x1fee   :  { %v5199_v8 = vpop.eup %5198 }
0x1fef   :  { %v4149_v20 = vsel %vm237_vm2, %v5199_v8, 0.0 }
0x1ff0   :  { %4150 = vadd.xlane.f32.xlu1 %v4149_v20 }
0x1ff4   :  { %4313 = vadd.xlane.f32.xlu1 %v4312_v45  ;;  %v5210_v45 = vld [vmem:[%s6051_s11] sm:$0xff] }
0x200c   :  { %v4059_v22 = vpop.f32.mrf.mxu0 }
0x200d   :  { %v4063_v23 = vadd.f32 %v4059_v22, %v3821_v57  ;;  %v4346_v57 = vsub.s32 6, %v5716_v30 }
0x200e   :  { %v5065_v11 = vpop.f32.mrf.mxu0 }
0x200f   :  { %v4347_v9 = vrot.slane %v5722_v33, %v4346_v57 }
0x2079   :  { %v4151_v25 = vpop.xlane.xlu1 %4150 }
0x207a   :  { %5200 = vrcp.f32 %v4151_v25 }
0x207d   :  { %v4314_v34 = vpop.xlane.xlu1 %4313 }
0x207e   :  { %v4318_v35 = vmul.f32 0.03125, %v4314_v34 }
0x2080   :  { %v4320_v37 = vsub.f32 %v4310_v21, %v4318_v35  ;;  %v4454_v21 = vsub.s32 2, %v5716_v30 }
0x2082   :  { %v4322_v47 = vmul.f32 %v4320_v37, %v4320_v37  ;;  %v4455_v22 = vrot.slane %v5210_v45, %v4454_v21 }
0x2084   :  { %v4324_v48 = vsel %vm148_vm0, %v4322_v47, 0.0 }
0x2087   :  { %v5201_v27 = vpop.eup %5200 }
0x2088   :  { %v4153_v28 = vmul.f32 %v5201_v27, %v5199_v8 }
0x208a   :  { %5074 = vmatmul.mubr.msk.f32.vlgmr.msra.gmra.mxu0 %vm237_vm2, %v4153_v28 }
0x208b   :  { %5082 = vmatpush3.msra.mxu0 %v4353_v26 }
0x208c   :  { %5083 = vmatprep.subr.mxu0 %v4352_v46 }
0x208d   :  { %5084 = vmatpush3.msra.mxu0 %v4352_v46 }
0x208e   :  { %5085 = vmatprep.subr.mxu0 %v4351_v62 }
0x208f   :  { %5086 = vmatpush3.msra.mxu0 %v4351_v62 }
0x2090   :  { %5087 = vmatprep.subr.mxu0 %v4350_v63 }
0x2091   :  { %5088 = vmatpush3.msra.mxu0 %v4350_v63 }
0x214a   :  { %v4226_v29 = vpop.f32.mrf.mxu0 }
0x214b   :  { %5079 = vmatmul.mubr.msk.f32.vlgmr.msra.gmra.mxu1 %vm237_vm2, %v4226_v29 }
0x214c   :  { %v5075_v32 = vpop.f32.mrf.mxu0 }
0x220b   :  { %v4299_v24 = vpop.f32.mrf.mxu1 }
0x220c   :  { %v4303_v36 = vadd.f32 %v4299_v24, %v4063_v23 }
0x220d   :  { %v5080_v31 = vpop.f32.mrf.mxu1 }
0x220e   :  { %v4309_v38 = vadd.f32 %v4307_v19, %v4303_v36 }
0x2210   :  { %v4311_v39 = vadd.f32 %v4309_v38, %v5775_v40  ;;  %v4340_v40 = vsub.s32 5, %v5716_v30 }
0x2212   :  { %v4315_v44 = vsel %vm148_vm0, %v4311_v39, 0.0  ;;  %v4341_v58 = vrot.slane %v5722_v33, %v4340_v40  ;;  %v4451_v33 = vld [vmem:[%s6050_s10 + $0x38] sm:$0xff] }
0x2213   :  { %4316 = vadd.xlane.f32.xlu1 %v4315_v44  ;;  %5092 = vmatprep.subr.mxu1 %v4451_v33 }
0x2214   :  { %5093 = vmatpush3.msra.mxu1 %v4451_v33 }
0x2215   :  { %5094 = vmatprep.subr.mxu1 %v4450_v0 }
0x2216   :  { %5095 = vmatpush3.msra.mxu1 %v4450_v0 }
0x2217   :  { %4325 = vadd.xlane.f32.xlu1 %v4324_v48  ;;  %5096 = vmatprep.subr.mxu1 %v4449_v1 }
0x2218   :  { %5097 = vmatpush3.msra.mxu1 %v4449_v1 }
0x2219   :  { %5098 = vmatprep.subr.mxu1 %v4448_v3 }
0x221a   :  { %5099 = vmatpush3.msra.mxu1 %v4448_v3 }
0x221b   :  { %5100 = vmatprep.subr.mxu1 %v4447_v12 }
0x221c   :  { %5101 = vmatpush3.msra.mxu1 %v4447_v12 }
0x221d   :  { %5102 = vmatprep.subr.mxu1 %v4446_v13 }
0x221e   :  { %5103 = vmatpush3.msra.mxu1 %v4446_v13 }
0x221f   :  { %5104 = vmatprep.subr.mxu1 %v4445_v4 }
0x2220   :  { %5105 = vmatpush3.msra.mxu1 %v4445_v4 }
0x2221   :  { %5106 = vmatprep.subr.mxu1 %v4444_v14 }
0x2222   :  { %5107 = vmatpush3.msra.mxu1 %v4444_v14 }
0x229c   :  { %v4317_v49 = vpop.xlane.xlu1 %4316 }
0x229d   :  { %v4319_v51 = vmul.f32 0.03125, %v4317_v49 }
0x229f   :  { %v4321_v52 = vsub.f32 %v4311_v39, %v4319_v51 }
0x22a0   :  { %v4326_v2 = vpop.xlane.xlu1 %4325 }
0x22a1   :  { %v4330_v16 = vmul.f32 0.03125, %v4326_v2  ;;  %v4323_v53 = vmul.f32 %v4321_v52, %v4321_v52 }
0x22a3   :  { %v4332_v54 = vadd.f32 1e-05, %v4330_v16  ;;  %v4327_v55 = vsel %vm148_vm0, %v4323_v53, 0.0 }
0x22a4   :  { %4328 = vadd.xlane.f32.xlu1 %v4327_v55 }
0x22a5   :  { %5202 = vrsqrt.f32 %v4332_v54  ;;  %v4568_v54 = vsub.s32 7, %v5716_v30 }
0x22a7   :  { %v4569_v55 = vrot.slane %v5210_v45, %v4568_v54 }
0x22b2   :  { %v5203_v59 = vpop.eup %5202 }
0x22b3   :  { %v4336_v60 = vmul.f32 %v5203_v59, %v4320_v37 }
0x22b5   :  { %v4342_v61 = vmul.f32 %v4341_v58, %v4336_v60 }
0x22b7   :  { %v5990_v50 = vadd.f32 %v4347_v9, %v4342_v61 }
0x22b9   :  { %5089 = vmatprep.mubr.msk.f32.mxu0 %vm148_vm0, %v5990_v50 }
0x232d   :  { %v4329_v42 = vpop.xlane.xlu1 %4328 }
0x232e   :  { %v4331_v56 = vmul.f32 0.03125, %v4329_v42 }
0x2330   :  { %v4333_v43 = vadd.f32 1e-05, %v4331_v56 }
0x2332   :  { %5204 = vrsqrt.f32 %v4333_v43 }
0x233f   :  { %v5205_v7 = vpop.eup %5204 }
0x2340   :  { %v4337_v5 = vmul.f32 %v5205_v7, %v4321_v52 }
0x2342   :  { %v4343_v41 = vmul.f32 %v4341_v58, %v4337_v5  ;;  %v4677_v58 = vld [vmem:[%s6051_s11 + $0x8] ss:$0 sm:$0xff] }
0x2344   :  { %v4349_v10 = vadd.f32 %v4347_v9, %v4343_v41 }
0x2346   :  { %5090 = vmatmul.mubr.msk.f32.vlgmr.msra.gmra.mxu0 %vm148_vm0, %v4349_v10 }
0x2406   :  { %v5091_v17 = vpop.f32.mrf.mxu0 }
0x2407   :  { %v4439_v18 = vadd.f32 %v5091_v17, %v4672_v15 }
0x2408   :  { %v4433_v19 = vpop.f32.mrf.mxu0 }
0x2409   :  { %v4434_v6 = vadd.f32 %v4672_v15, %v4433_v19  ;;  %v4443_v20 = vmax.f32 %v4439_v18, 0.0 }
0x240b   :  { %v4442_v8 = vmax.f32 %v4434_v6, 0.0 }
0x240d   :  { %5108 = vmatprep.mubr.msk.f32.mxu1 %vm4456_vm3, %v4442_v8 }
0x240e   :  { %5109 = vmatmul.mubr.msk.f32.vlgmr.msra.gmra.mxu1 %vm4456_vm3, %v4443_v20 }
0x24ce   :  { %v5110_v23 = vpop.f32.mrf.mxu1 }
0x24cf   :  { %v4535_v11 = vadd.f32 %v5110_v23, %v4455_v22 }
0x24d0   :  { %v4529_v25 = vpop.f32.mrf.mxu1 }
0x24d1   :  { %v4530_v27 = vadd.f32 %v4529_v25, %v4455_v22  ;;  %v4539_v28 = vadd.f32 %v4535_v11, %v4349_v10 }
0x24d3   :  { %v4543_v29 = vsel %vm148_vm0, %v4539_v28, 0.0  ;;  %v4538_v32 = vadd.f32 %v4530_v27, %v5990_v50 }
0x24d4   :  { %4544 = vadd.xlane.f32.xlu0 %v4543_v29 }
0x24d5   :  { %v4540_v34 = vsel %vm148_vm0, %v4538_v32, 0.0 }
0x24d6   :  { %4541 = vadd.xlane.f32.xlu1 %v4540_v34 }
0x255d   :  { %v4545_v35 = vpop.xlane.xlu0 %4544 }
0x255e   :  { %v4547_v24 = vmul.f32 0.03125, %v4545_v35 }
0x255f   :  { %v4542_v36 = vpop.xlane.xlu1 %4541 }
0x2560   :  { %v4546_v31 = vmul.f32 0.03125, %v4542_v36  ;;  %v4549_v37 = vsub.f32 %v4539_v28, %v4547_v24 }
0x2562   :  { %v4548_v38 = vsub.f32 %v4538_v32, %v4546_v31  ;;  %v4551_v47 = vmul.f32 %v4549_v37, %v4549_v37 }
0x2564   :  { %v4550_v39 = vmul.f32 %v4548_v38, %v4548_v38  ;;  %v4555_v48 = vsel %vm148_vm0, %v4551_v47, 0.0 }
0x2566   :  { %v4552_v44 = vsel %vm148_vm0, %v4550_v39, 0.0 }
0x2567   :  { %4553 = vadd.xlane.f32.xlu1 %v4552_v44 }
0x256b   :  { %4556 = vadd.xlane.f32.xlu1 %v4555_v48 }
0x25f0   :  { %v4554_v49 = vpop.xlane.xlu1 %4553 }
0x25f1   :  { %v4558_v51 = vmul.f32 0.03125, %v4554_v49 }
0x25f3   :  { %v4560_v52 = vadd.f32 1e-05, %v4558_v51 }
0x25f4   :  { %v4557_v2 = vpop.xlane.xlu1 %4556 }
0x25f5   :  { %5206 = vrsqrt.f32 %v4560_v52  ;;  %v4559_v16 = vmul.f32 0.03125, %v4557_v2 }
0x25f7   :  { %v4561_v53 = vadd.f32 1e-05, %v4559_v16 }
0x25f9   :  { %5208 = vrsqrt.f32 %v4561_v53 }
0x2602   :  { %v5207_v40 = vpop.eup %5206 }
0x2603   :  { %v4564_v57 = vmul.f32 %v5207_v40, %v4548_v38 }
0x2605   :  { %v4570_v59 = vmul.f32 %v4569_v55, %v4564_v57 }
0x2606   :  { %v5209_v60 = vpop.eup %5208 }
0x2607   :  { %v4565_v9 = vmul.f32 %v5209_v60, %v4549_v37  ;;  %v4576_v61 = vadd.f32 %v4677_v58, %v4570_v59 }
0x2609   :  { %v4571_v50 = vmul.f32 %v4569_v55, %v4565_v9  ;;  %4578 = vst.msk [vmem:[#allocation14] sm:$0xff] %vm148_vm0, %v4576_v61 }
0x260b   :  { %v4577_v26 = vadd.f32 %v4677_v58, %v4571_v50 }
0x260d   :  { %4579 = vst.msk [vmem:[#allocation14 + $0x8] sm:$0xff] %vm148_vm0, %v4577_v26 }
0x260e   :  { %5362 = shalt.err (!%p5359_p11)
}
0x260f   :  { %4591 = dma.vmem_to_hbm [thread:$0]  %s4586_s24, 256, %s6052_s12, [#allocation4], %s5383_s26, %s5383_s26, %s5384_s27  }
0x2610   :  { %5379 = dma.done.wait [#allocation4], 256  }
0x2611   :  { %5380 = vsyncadd [#allocation4], 4294967040 }
0x2612   :  { %4595 = vsyncpa [#allocation3], 1 }
0x2613   :  { %4596 = vsyncpa [#allocation6], 1 }
0x2614   :  { %4597 = vsyncpa [#allocation9], 1 }
0x2615   :  { %4598 = vsyncpa [#allocation12], 1 }
0x2616   :  { %4599 = vsyncpa [#allocation4], 1 }

</bundles_post_ra>
